<compile_context>
chip_gen: v6e
topology: v6e:2x2x1
jax: 0.10.0
libtpu: 0.0.40
codegen_flags: <defaults>
</compile_context>

<pallas_src>
import functools
import math

import jax
import jax.numpy as jnp
from jax.experimental import pallas as pl
from jax.experimental.pallas import tpu as pltpu


# ----------------------------- in-kernel helpers -----------------------------

def _layer_norm(x, gamma, beta, eps=1e-5):
    mean = jnp.mean(x, axis=-1, keepdims=True)
    var = jnp.mean((x - mean) ** 2, axis=-1, keepdims=True)  # biased, like nn.LayerNorm
    return (x - mean) * jax.lax.rsqrt(var + eps) * gamma + beta


# ----------------------------- Pallas kernels --------------------------------

def _transformer_block_kernel(num_heads,
                              x_q_ref, x_kv_ref,
                              wq_ref, bq_ref, wkv_ref, bkv_ref,
                              wo_ref, bo_ref,
                              g1_ref, be1_ref,
                              w1_ref, b1_ref, w2_ref, b2_ref,
                              g2_ref, be2_ref,
                              o_ref):
    """Fused transformer block for one (batch, q-tile): MHA + residual + LN + FFN + residual + LN."""
    xq = x_q_ref[0]                                  # (Tq, D) f32  — query rows of this tile
    xkv = x_kv_ref[0]                                # (S,  D) f32  — full sequence for K/V
    tq, d_model = xq.shape
    d_head = d_model // num_heads
    scale = 1.0 / math.sqrt(d_head)

    xq_b = xq.astype(jnp.bfloat16)
    xkv_b = xkv.astype(jnp.bfloat16)

    # Q projection on the query tile only; attention scale hoisted into q (S*D muls, not S*S).
    q = (jnp.dot(xq_b, wq_ref[...], preferred_element_type=jnp.float32)
         + bq_ref[...]) * scale                      # (Tq, D) f32
    # Fused K/V projection over the full sequence: one MXU pass with N = 2*D.
    kv = (jnp.dot(xkv_b, wkv_ref[...], preferred_element_type=jnp.float32)
          + bkv_ref[...])                            # (S, 2D) f32

    q_b = q.astype(jnp.bfloat16)
    kv_b = kv.astype(jnp.bfloat16)

    # Per-head attention. The output projection is applied per head and accumulated,
    # so no concatenate of head outputs (no lane-dim copies) is needed.
    attn_out = jnp.zeros((tq, d_model), jnp.float32) + bo_ref[...]
    for h in range(num_heads):
        lo, hi = h * d_head, (h + 1) * d_head
        qh = q_b[:, lo:hi]                           # (Tq, dh)
        kh = kv_b[:, lo:hi]                          # (S,  dh)
        vh = kv_b[:, d_model + lo:d_model + hi]      # (S,  dh)
        # scores = q @ k^T without an explicit transpose (contract last dims).
        scores = jax.lax.dot_general(qh, kh, (((1,), (1,)), ((), ())),
                                     preferred_element_type=jnp.float32)  # (Tq, S)
        scores = scores - jnp.max(scores, axis=-1, keepdims=True)
        p = jnp.exp(scores)
        p = p * pl.reciprocal(jnp.sum(p, axis=-1, keepdims=True), approx=True)
        ctx = jnp.dot(p.astype(jnp.bfloat16), vh,
                      preferred_element_type=jnp.float32)                 # (Tq, dh)
        attn_out = attn_out + jnp.dot(ctx.astype(jnp.bfloat16),
                                      wo_ref[lo:hi, :],
                                      preferred_element_type=jnp.float32)

    # residual + LayerNorm 1 (f32)
    x1 = _layer_norm(xq + attn_out, g1_ref[...], be1_ref[...])

    # feed-forward: Linear -> ReLU -> Linear (bf16 operands, f32 accumulation)
    hdn = jnp.maximum(
        jnp.dot(x1.astype(jnp.bfloat16), w1_ref[...],
                preferred_element_type=jnp.float32) + b1_ref[...], 0.0)
    ff = jnp.dot(hdn.astype(jnp.bfloat16), w2_ref[...],
                 preferred_element_type=jnp.float32) + b2_ref[...]

    # residual + LayerNorm 2 (f32)
    o_ref[0] = _layer_norm(x1 + ff, g2_ref[...], be2_ref[...])


def _final_norm_lm_head_kernel(x_ref, g_ref, b_ref, w_ref, hidden_ref, logits_ref):
    """Final LayerNorm fused with a vocab-tiled LM head matmul."""
    h = _layer_norm(x_ref[0], g_ref[...], b_ref[...])          # (S, D) f32
    hidden_ref[0] = h                                          # same value for every vocab tile
    logits_ref[0] = jnp.dot(h.astype(jnp.bfloat16), w_ref[...],
                            preferred_element_type=jnp.float32)


# ----------------------------- pallas_call wrappers ---------------------------

def _rep_spec(shape):
    """BlockSpec for a weight replicated across the whole grid."""
    n = len(shape)
    return pl.BlockSpec(shape, lambda *_, _n=n: (0,) * _n)


def _pick_tile(n, target, quantum):
    """Largest multiple of `quantum` that divides n and is <= target (else n)."""
    if n <= target:
        return n
    best = n
    t = quantum
    while t <= target:
        if n % t == 0:
            best = t
        t += quantum
    return best if best <= target else n


def _vmem_limit(block_bytes):
    """Explicit scoped-VMEM limit: double-buffered pipeline blocks + headroom, capped for v7x."""
    need = 2 * sum(block_bytes) + (8 << 20)
    return int(min(max(need, 16 << 20), 64 << 20))


def transformer_block(x, p, num_heads, tq=None):
    B, S, D = x.shape
    if tq is None:
        tq = _pick_tile(S, 256, 8)

    # Host-side fusion / bf16 cast of matmul weights (biases & LN params stay f32).
    wq = p["wq"].astype(jnp.bfloat16)
    wkv = jnp.concatenate([p["wk"], p["wv"]], axis=1).astype(jnp.bfloat16)   # (D, 2D)
    bkv = jnp.concatenate([p["bk"], p["bv"]], axis=1)                        # (1, 2D)
    wo = p["wo"].astype(jnp.bfloat16)
    w1 = p["w1"].astype(jnp.bfloat16)
    w2 = p["w2"].astype(jnp.bfloat16)

    weights = [wq, p["bq"], wkv, bkv, wo, p["bo"],
               p["g1"], p["be1"], w1, p["b1"], w2, p["b2"], p["g2"], p["be2"]]

    in_specs = ([pl.BlockSpec((1, tq, D), lambda b, qi: (b, qi, 0)),   # query tile
                 pl.BlockSpec((1, S, D), lambda b, qi: (b, 0, 0))]     # full sequence for K/V
                + [_rep_spec(w.shape) for w in weights])

    block_bytes = ([tq * D * 4, S * D * 4, tq * D * 4]
                   + [int(w.size) * w.dtype.itemsize for w in weights])

    return pl.pallas_call(
        functools.partial(_transformer_block_kernel, num_heads),
        out_shape=jax.ShapeDtypeStruct((B, S, D), jnp.float32),
        grid_spec=pltpu.PrefetchScalarGridSpec(
            num_scalar_prefetch=0,
            grid=(B, S // tq),
            in_specs=in_specs,
            out_specs=pl.BlockSpec((1, tq, D), lambda b, qi: (b, qi, 0))),
        compiler_params=pltpu.CompilerParams(
            dimension_semantics=("parallel", "parallel"),
            vmem_limit_bytes=_vmem_limit(block_bytes)),
    )(x, x, *weights)


def final_norm_and_lm_head(x, gamma, beta, w):
    B, S, D = x.shape
    V = w.shape[1]
    tv = _pick_tile(V, 2048, 128)
    w_bf16 = w.astype(jnp.bfloat16)

    block_bytes = [S * D * 4, int(gamma.size) * 4, int(beta.size) * 4,
                   D * tv * 2, S * D * 4, S * tv * 4]

    hidden, logits = pl.pallas_call(
        _final_norm_lm_head_kernel,
        out_shape=(jax.ShapeDtypeStruct((B, S, D), jnp.float32),
                   jax.ShapeDtypeStruct((B, S, V), jnp.float32)),
        grid_spec=pltpu.PrefetchScalarGridSpec(
            num_scalar_prefetch=0,
            grid=(B, V // tv),
            in_specs=[pl.BlockSpec((1, S, D), lambda b, j: (b, 0, 0)),
                      _rep_spec(gamma.shape),
                      _rep_spec(beta.shape),
                      pl.BlockSpec((D, tv), lambda b, j: (0, j))],
            out_specs=(pl.BlockSpec((1, S, D), lambda b, j: (b, 0, 0)),   # resident across vocab axis
                       pl.BlockSpec((1, S, tv), lambda b, j: (b, 0, j)))),
        compiler_params=pltpu.CompilerParams(
            dimension_semantics=("parallel", "arbitrary"),
            vmem_limit_bytes=_vmem_limit(block_bytes)),
    )(x, gamma, beta, w_bf16)
    return hidden, logits


# ----------------------------- parameter init ---------------------------------

def init_params(key, vocab_size, d_model, num_heads, num_layers, d_ff, max_seq_len):
    keys = jax.random.split(key, 3 + num_layers)
    params = {
        "tok_emb": jax.random.normal(keys[0], (vocab_size, d_model), jnp.float32),
        "pos_emb": jax.random.normal(keys[1], (max_seq_len, d_model), jnp.float32),
        "lm_head_w": 0.02 * jax.random.normal(keys[2], (d_model, vocab_size), jnp.float32),
        "final_g": jnp.ones((1, d_model), jnp.float32),
        "final_b": jnp.zeros((1, d_model), jnp.float32),
    }

    def lin(k, din, dout):
        return 0.02 * jax.random.normal(k, (din, dout), jnp.float32)  # GPT-style N(0, 0.02)

    blocks = []
    for i in range(num_layers):
        lk = jax.random.split(keys[3 + i], 6)
        blocks.append(dict(
            wq=lin(lk[0], d_model, d_model), bq=jnp.zeros((1, d_model), jnp.float32),
            wk=lin(lk[1], d_model, d_model), bk=jnp.zeros((1, d_model), jnp.float32),
            wv=lin(lk[2], d_model, d_model), bv=jnp.zeros((1, d_model), jnp.float32),
            wo=lin(lk[3], d_model, d_model), bo=jnp.zeros((1, d_model), jnp.float32),
            g1=jnp.ones((1, d_model), jnp.float32), be1=jnp.zeros((1, d_model), jnp.float32),
            w1=lin(lk[4], d_model, d_ff), b1=jnp.zeros((1, d_ff), jnp.float32),
            w2=lin(lk[5], d_ff, d_model), b2=jnp.zeros((1, d_model), jnp.float32),
            g2=jnp.ones((1, d_model), jnp.float32), be2=jnp.zeros((1, d_model), jnp.float32),
        ))
    params["blocks"] = blocks
    return params


# ----------------------------- model forward ----------------------------------

def gpt_forward(params, token_ids, num_heads):
    B, S = token_ids.shape
    # CombinedEmbedding: token embedding + learned positional embedding (dropout = identity).
    x = params["tok_emb"][token_ids] + params["pos_emb"][:S][None, :, :]
    layer_outputs = []
    for blk in params["blocks"]:
        x = transformer_block(x, blk, num_heads)
        layer_outputs.append(x)
    hidden, logits = final_norm_and_lm_head(x, params["final_g"], params["final_b"],
                                            params["lm_head_w"])
    return {"logits": logits, "last_hidden_state": hidden, "layer_outputs": layer_outputs}


# ----------------------------- pure-JAX reference ------------------------------

def _ref_block(x, p, num_heads):
    S, D = x.shape[1], x.shape[2]
    dh = D // num_heads
    q = x @ p["wq"] + p["bq"]
    k = x @ p["wk"] + p["bk"]
    v = x @ p["wv"] + p["bv"]

    def split(t):  # (B,S,D) -> (B,H,S,dh)
        return t.reshape(t.shape[0], S, num_heads, dh).transpose(0, 2, 1, 3)

    qh, kh, vh = split(q), split(k), split(v)
    scores = jnp.einsum("bhqd,bhkd->bhqk", qh, kh) / math.sqrt(dh)
    w = jax.nn.softmax(scores, axis=-1)
    attn = jnp.einsum("bhqk,bhkd->bhqd", w, vh).transpose(0, 2, 1, 3).reshape(x.shape)
    attn_out = attn @ p["wo"] + p["bo"]
    x1 = _layer_norm(x + attn_out, p["g1"], p["be1"])
    ff = jnp.maximum(x1 @ p["w1"] + p["b1"], 0.0) @ p["w2"] + p["b2"]
    return _layer_norm(x1 + ff, p["g2"], p["be2"])


def gpt_forward_ref(params, token_ids, num_heads):
    S = token_ids.shape[1]
    x = params["tok_emb"][token_ids] + params["pos_emb"][:S][None, :, :]
    for blk in params["blocks"]:
        x = _ref_block(x, blk, num_heads)
    hidden = _layer_norm(x, params["final_g"], params["final_b"])
    return hidden @ params["lm_head_w"]


# ----------------------------- main --------------------------------------------

if __name__ == "__main__":
    B, S = 2, 8
    vocab_size, d_model, num_heads, num_layers, d_ff, max_seq_len = 64, 32, 4, 2, 64, 16

    key = jax.random.PRNGKey(0)
    pkey, tkey = jax.random.split(key)
    params = init_params(pkey, vocab_size, d_model, num_heads, num_layers, d_ff, max_seq_len)
    token_ids = jax.random.randint(tkey, (B, S), 0, vocab_size, dtype=jnp.int32)

    out = gpt_forward(params, token_ids, num_heads)
    logits = jax.block_until_ready(out["logits"])

    ref_logits = gpt_forward_ref(params, token_ids, num_heads)
    assert logits.shape == (B, S, vocab_size)
    assert out["last_hidden_state"].shape == (B, S, d_model)
    # bf16 matmul operands (f32 accumulation) vs f32 reference -> slightly looser tolerance.
    assert jnp.allclose(logits, ref_logits, atol=2e-2, rtol=2e-2), "mismatch vs reference"

    print("KERNEL_OK")
</pallas_src>

<mosaic_0001>
module attributes {stable_mosaic.version = 11 : i64} {
  func.func @_transformer_block_kernel(%arg0: i32, %arg1: i32, %arg2: memref<1x8x32xf32, #tpu.memory_space<vmem>>, %arg3: memref<1x8x32xf32, #tpu.memory_space<vmem>>, %arg4: memref<32x32xbf16, #tpu.memory_space<vmem>>, %arg5: memref<1x32xf32, #tpu.memory_space<vmem>>, %arg6: memref<32x64xbf16, #tpu.memory_space<vmem>>, %arg7: memref<1x64xf32, #tpu.memory_space<vmem>>, %arg8: memref<32x32xbf16, #tpu.memory_space<vmem>>, %arg9: memref<1x32xf32, #tpu.memory_space<vmem>>, %arg10: memref<1x32xf32, #tpu.memory_space<vmem>>, %arg11: memref<1x32xf32, #tpu.memory_space<vmem>>, %arg12: memref<32x64xbf16, #tpu.memory_space<vmem>>, %arg13: memref<1x64xf32, #tpu.memory_space<vmem>>, %arg14: memref<64x32xbf16, #tpu.memory_space<vmem>>, %arg15: memref<1x32xf32, #tpu.memory_space<vmem>>, %arg16: memref<1x32xf32, #tpu.memory_space<vmem>>, %arg17: memref<1x32xf32, #tpu.memory_space<vmem>>, %arg18: memref<1x8x32xf32, #tpu.memory_space<vmem>>) attributes {dimension_semantics = [#tpu.dimension_semantics<parallel>, #tpu.dimension_semantics<parallel>], iteration_bounds = array<i64: 2, 1>, scalar_prefetch = 0 : i64, scratch_operands = 0 : i64, tpu.core_type = #tpu.core_type<tc>, window_params = [{transform_indices = @transform_0, window_bounds = array<i64: 1, 8, 32>}, {transform_indices = @transform_1, window_bounds = array<i64: 1, 8, 32>}, {pipeline_mode = #tpu.pipeline_mode<synchronous>, transform_indices = @transform_2, window_bounds = array<i64: 32, 32>}, {pipeline_mode = #tpu.pipeline_mode<synchronous>, transform_indices = @transform_3, window_bounds = array<i64: 1, 32>}, {pipeline_mode = #tpu.pipeline_mode<synchronous>, transform_indices = @transform_4, window_bounds = array<i64: 32, 64>}, {pipeline_mode = #tpu.pipeline_mode<synchronous>, transform_indices = @transform_5, window_bounds = array<i64: 1, 64>}, {pipeline_mode = #tpu.pipeline_mode<synchronous>, transform_indices = @transform_6, window_bounds = array<i64: 32, 32>}, {pipeline_mode = #tpu.pipeline_mode<synchronous>, transform_indices = @transform_7, window_bounds = array<i64: 1, 32>}, {pipeline_mode = #tpu.pipeline_mode<synchronous>, transform_indices = @transform_8, window_bounds = array<i64: 1, 32>}, {pipeline_mode = #tpu.pipeline_mode<synchronous>, transform_indices = @transform_9, window_bounds = array<i64: 1, 32>}, {pipeline_mode = #tpu.pipeline_mode<synchronous>, transform_indices = @transform_10, window_bounds = array<i64: 32, 64>}, {pipeline_mode = #tpu.pipeline_mode<synchronous>, transform_indices = @transform_11, window_bounds = array<i64: 1, 64>}, {pipeline_mode = #tpu.pipeline_mode<synchronous>, transform_indices = @transform_12, window_bounds = array<i64: 64, 32>}, {pipeline_mode = #tpu.pipeline_mode<synchronous>, transform_indices = @transform_13, window_bounds = array<i64: 1, 32>}, {pipeline_mode = #tpu.pipeline_mode<synchronous>, transform_indices = @transform_14, window_bounds = array<i64: 1, 32>}, {pipeline_mode = #tpu.pipeline_mode<synchronous>, transform_indices = @transform_15, window_bounds = array<i64: 1, 32>}, {transform_indices = @transform_16, window_bounds = array<i64: 1, 8, 32>}]} {
    %c0 = arith.constant 0 : index
    %c0_0 = arith.constant 0 : index
    %c0_1 = arith.constant 0 : index
    %0 = vector.load %arg2[%c0, %c0_0, %c0_1] : memref<1x8x32xf32, #tpu.memory_space<vmem>>, vector<1x8x32xf32>
    %1 = vector.shape_cast %0 : vector<1x8x32xf32> to vector<8x32xf32>
    %c0_2 = arith.constant 0 : index
    %c0_3 = arith.constant 0 : index
    %c0_4 = arith.constant 0 : index
    %2 = vector.load %arg3[%c0_2, %c0_3, %c0_4] : memref<1x8x32xf32, #tpu.memory_space<vmem>>, vector<1x8x32xf32>
    %3 = vector.shape_cast %2 : vector<1x8x32xf32> to vector<8x32xf32>
    %4 = arith.truncf %1 : vector<8x32xf32> to vector<8x32xbf16>
    %5 = arith.truncf %3 : vector<8x32xf32> to vector<8x32xbf16>
    %c0_5 = arith.constant 0 : index
    %c0_6 = arith.constant 0 : index
    %6 = vector.load %arg4[%c0_5, %c0_6] : memref<32x32xbf16, #tpu.memory_space<vmem>>, vector<32x32xbf16>
    %cst = arith.constant dense<0.000000e+00> : vector<8x32xf32>
    %7 = tpu.matmul %4, %6, %cst {dimension_numbers = #tpu.dot_dimension_numbers<[1], [0], [0], [1], [0, 0, 1, 1], [], []>} : vector<8x32xbf16>, vector<32x32xbf16>, vector<8x32xf32> -> vector<8x32xf32>
    %c0_7 = arith.constant 0 : index
    %c0_8 = arith.constant 0 : index
    %8 = vector.load %arg5[%c0_7, %c0_8] : memref<1x32xf32, #tpu.memory_space<vmem>>, vector<1x32xf32>
    %9 = vector.broadcast %8 : vector<1x32xf32> to vector<8x32xf32>
    %10 = arith.addf %7, %9 : vector<8x32xf32>
    %cst_9 = arith.constant 0.353553385 : f32
    %11 = vector.broadcast %cst_9 : f32 to vector<8x32xf32>
    %12 = arith.mulf %10, %11 : vector<8x32xf32>
    %c0_10 = arith.constant 0 : index
    %c0_11 = arith.constant 0 : index
    %13 = vector.load %arg6[%c0_10, %c0_11] : memref<32x64xbf16, #tpu.memory_space<vmem>>, vector<32x64xbf16>
    %cst_12 = arith.constant dense<0.000000e+00> : vector<8x64xf32>
    %14 = tpu.matmul %5, %13, %cst_12 {dimension_numbers = #tpu.dot_dimension_numbers<[1], [0], [0], [1], [0, 0, 1, 1], [], []>} : vector<8x32xbf16>, vector<32x64xbf16>, vector<8x64xf32> -> vector<8x64xf32>
    %c0_13 = arith.constant 0 : index
    %c0_14 = arith.constant 0 : index
    %15 = vector.load %arg7[%c0_13, %c0_14] : memref<1x64xf32, #tpu.memory_space<vmem>>, vector<1x64xf32>
    %16 = vector.broadcast %15 : vector<1x64xf32> to vector<8x64xf32>
    %17 = arith.addf %14, %16 : vector<8x64xf32>
    %18 = arith.truncf %12 : vector<8x32xf32> to vector<8x32xbf16>
    %19 = arith.truncf %17 : vector<8x64xf32> to vector<8x64xbf16>
    %cst_15 = arith.constant 0.000000e+00 : f32
    %20 = vector.broadcast %cst_15 : f32 to vector<8x32xf32>
    %c0_16 = arith.constant 0 : index
    %c0_17 = arith.constant 0 : index
    %21 = vector.load %arg9[%c0_16, %c0_17] : memref<1x32xf32, #tpu.memory_space<vmem>>, vector<1x32xf32>
    %22 = vector.broadcast %21 : vector<1x32xf32> to vector<8x32xf32>
    %23 = arith.addf %20, %22 : vector<8x32xf32>
    %24 = vector.extract_strided_slice %18 {offsets = [0, 0], sizes = [8, 8], strides = [1, 1]} : vector<8x32xbf16> to vector<8x8xbf16>
    %25 = vector.extract_strided_slice %19 {offsets = [0, 0], sizes = [8, 8], strides = [1, 1]} : vector<8x64xbf16> to vector<8x8xbf16>
    %26 = vector.extract_strided_slice %19 {offsets = [0, 32], sizes = [8, 8], strides = [1, 1]} : vector<8x64xbf16> to vector<8x8xbf16>
    %cst_18 = arith.constant dense<0.000000e+00> : vector<8x8xf32>
    %27 = tpu.matmul %24, %25, %cst_18 {dimension_numbers = #tpu.dot_dimension_numbers<[1], [1], [0], [0], [0, 0, 1, 0], [], []>} : vector<8x8xbf16>, vector<8x8xbf16>, vector<8x8xf32> -> vector<8x8xf32>
    %cst_19 = arith.constant dense<0xFF800000> : vector<8xf32>
    %28 = vector.multi_reduction <maximumf>, %27, %cst_19 [1] : vector<8x8xf32> to vector<8xf32>
    %29 = vector.shape_cast %28 : vector<8xf32> to vector<8x1xf32>
    %30 = vector.broadcast %29 : vector<8x1xf32> to vector<8x8xf32>
    %31 = arith.subf %27, %30 : vector<8x8xf32>
    %32 = math.exp %31 : vector<8x8xf32>
    %cst_20 = arith.constant dense<0.000000e+00> : vector<8xf32>
    %33 = vector.multi_reduction <add>, %32, %cst_20 [1] : vector<8x8xf32> to vector<8xf32>
    %34 = vector.shape_cast %33 : vector<8xf32> to vector<8x1xf32>
    %35 = tpu.reciprocal %34 {approx = true} : vector<8x1xf32> -> vector<8x1xf32>
    %36 = vector.broadcast %35 : vector<8x1xf32> to vector<8x8xf32>
    %37 = arith.mulf %32, %36 : vector<8x8xf32>
    %38 = arith.truncf %37 : vector<8x8xf32> to vector<8x8xbf16>
    %cst_21 = arith.constant dense<0.000000e+00> : vector<8x8xf32>
    %39 = tpu.matmul %38, %26, %cst_21 {dimension_numbers = #tpu.dot_dimension_numbers<[1], [0], [0], [1], [0, 0, 1, 1], [], []>} : vector<8x8xbf16>, vector<8x8xbf16>, vector<8x8xf32> -> vector<8x8xf32>
    %40 = arith.truncf %39 : vector<8x8xf32> to vector<8x8xbf16>
    %c0_22 = arith.constant 0 : index
    %c0_23 = arith.constant 0 : index
    %41 = vector.load %arg8[%c0_22, %c0_23] : memref<32x32xbf16, #tpu.memory_space<vmem>>, vector<8x32xbf16>
    %cst_24 = arith.constant dense<0.000000e+00> : vector<8x32xf32>
    %42 = tpu.matmul %40, %41, %cst_24 {dimension_numbers = #tpu.dot_dimension_numbers<[1], [0], [0], [1], [0, 0, 1, 1], [], []>} : vector<8x8xbf16>, vector<8x32xbf16>, vector<8x32xf32> -> vector<8x32xf32>
    %43 = arith.addf %23, %42 : vector<8x32xf32>
    %44 = vector.extract_strided_slice %18 {offsets = [0, 8], sizes = [8, 8], strides = [1, 1]} : vector<8x32xbf16> to vector<8x8xbf16>
    %45 = vector.extract_strided_slice %19 {offsets = [0, 8], sizes = [8, 8], strides = [1, 1]} : vector<8x64xbf16> to vector<8x8xbf16>
    %46 = vector.extract_strided_slice %19 {offsets = [0, 40], sizes = [8, 8], strides = [1, 1]} : vector<8x64xbf16> to vector<8x8xbf16>
    %cst_25 = arith.constant dense<0.000000e+00> : vector<8x8xf32>
    %47 = tpu.matmul %44, %45, %cst_25 {dimension_numbers = #tpu.dot_dimension_numbers<[1], [1], [0], [0], [0, 0, 1, 0], [], []>} : vector<8x8xbf16>, vector<8x8xbf16>, vector<8x8xf32> -> vector<8x8xf32>
    %cst_26 = arith.constant dense<0xFF800000> : vector<8xf32>
    %48 = vector.multi_reduction <maximumf>, %47, %cst_26 [1] : vector<8x8xf32> to vector<8xf32>
    %49 = vector.shape_cast %48 : vector<8xf32> to vector<8x1xf32>
    %50 = vector.broadcast %49 : vector<8x1xf32> to vector<8x8xf32>
    %51 = arith.subf %47, %50 : vector<8x8xf32>
    %52 = math.exp %51 : vector<8x8xf32>
    %cst_27 = arith.constant dense<0.000000e+00> : vector<8xf32>
    %53 = vector.multi_reduction <add>, %52, %cst_27 [1] : vector<8x8xf32> to vector<8xf32>
    %54 = vector.shape_cast %53 : vector<8xf32> to vector<8x1xf32>
    %55 = tpu.reciprocal %54 {approx = true} : vector<8x1xf32> -> vector<8x1xf32>
    %56 = vector.broadcast %55 : vector<8x1xf32> to vector<8x8xf32>
    %57 = arith.mulf %52, %56 : vector<8x8xf32>
    %58 = arith.truncf %57 : vector<8x8xf32> to vector<8x8xbf16>
    %cst_28 = arith.constant dense<0.000000e+00> : vector<8x8xf32>
    %59 = tpu.matmul %58, %46, %cst_28 {dimension_numbers = #tpu.dot_dimension_numbers<[1], [0], [0], [1], [0, 0, 1, 1], [], []>} : vector<8x8xbf16>, vector<8x8xbf16>, vector<8x8xf32> -> vector<8x8xf32>
    %60 = arith.truncf %59 : vector<8x8xf32> to vector<8x8xbf16>
    %c8 = arith.constant 8 : index
    %c0_29 = arith.constant 0 : index
    %61 = vector.load %arg8[%c8, %c0_29] : memref<32x32xbf16, #tpu.memory_space<vmem>>, vector<8x32xbf16>
    %cst_30 = arith.constant dense<0.000000e+00> : vector<8x32xf32>
    %62 = tpu.matmul %60, %61, %cst_30 {dimension_numbers = #tpu.dot_dimension_numbers<[1], [0], [0], [1], [0, 0, 1, 1], [], []>} : vector<8x8xbf16>, vector<8x32xbf16>, vector<8x32xf32> -> vector<8x32xf32>
    %63 = arith.addf %43, %62 : vector<8x32xf32>
    %64 = vector.extract_strided_slice %18 {offsets = [0, 16], sizes = [8, 8], strides = [1, 1]} : vector<8x32xbf16> to vector<8x8xbf16>
    %65 = vector.extract_strided_slice %19 {offsets = [0, 16], sizes = [8, 8], strides = [1, 1]} : vector<8x64xbf16> to vector<8x8xbf16>
    %66 = vector.extract_strided_slice %19 {offsets = [0, 48], sizes = [8, 8], strides = [1, 1]} : vector<8x64xbf16> to vector<8x8xbf16>
    %cst_31 = arith.constant dense<0.000000e+00> : vector<8x8xf32>
    %67 = tpu.matmul %64, %65, %cst_31 {dimension_numbers = #tpu.dot_dimension_numbers<[1], [1], [0], [0], [0, 0, 1, 0], [], []>} : vector<8x8xbf16>, vector<8x8xbf16>, vector<8x8xf32> -> vector<8x8xf32>
    %cst_32 = arith.constant dense<0xFF800000> : vector<8xf32>
    %68 = vector.multi_reduction <maximumf>, %67, %cst_32 [1] : vector<8x8xf32> to vector<8xf32>
    %69 = vector.shape_cast %68 : vector<8xf32> to vector<8x1xf32>
    %70 = vector.broadcast %69 : vector<8x1xf32> to vector<8x8xf32>
    %71 = arith.subf %67, %70 : vector<8x8xf32>
    %72 = math.exp %71 : vector<8x8xf32>
    %cst_33 = arith.constant dense<0.000000e+00> : vector<8xf32>
    %73 = vector.multi_reduction <add>, %72, %cst_33 [1] : vector<8x8xf32> to vector<8xf32>
    %74 = vector.shape_cast %73 : vector<8xf32> to vector<8x1xf32>
    %75 = tpu.reciprocal %74 {approx = true} : vector<8x1xf32> -> vector<8x1xf32>
    %76 = vector.broadcast %75 : vector<8x1xf32> to vector<8x8xf32>
    %77 = arith.mulf %72, %76 : vector<8x8xf32>
    %78 = arith.truncf %77 : vector<8x8xf32> to vector<8x8xbf16>
    %cst_34 = arith.constant dense<0.000000e+00> : vector<8x8xf32>
    %79 = tpu.matmul %78, %66, %cst_34 {dimension_numbers = #tpu.dot_dimension_numbers<[1], [0], [0], [1], [0, 0, 1, 1], [], []>} : vector<8x8xbf16>, vector<8x8xbf16>, vector<8x8xf32> -> vector<8x8xf32>
    %80 = arith.truncf %79 : vector<8x8xf32> to vector<8x8xbf16>
    %c16 = arith.constant 16 : index
    %c0_35 = arith.constant 0 : index
    %81 = vector.load %arg8[%c16, %c0_35] : memref<32x32xbf16, #tpu.memory_space<vmem>>, vector<8x32xbf16>
    %cst_36 = arith.constant dense<0.000000e+00> : vector<8x32xf32>
    %82 = tpu.matmul %80, %81, %cst_36 {dimension_numbers = #tpu.dot_dimension_numbers<[1], [0], [0], [1], [0, 0, 1, 1], [], []>} : vector<8x8xbf16>, vector<8x32xbf16>, vector<8x32xf32> -> vector<8x32xf32>
    %83 = arith.addf %63, %82 : vector<8x32xf32>
    %84 = vector.extract_strided_slice %18 {offsets = [0, 24], sizes = [8, 8], strides = [1, 1]} : vector<8x32xbf16> to vector<8x8xbf16>
    %85 = vector.extract_strided_slice %19 {offsets = [0, 24], sizes = [8, 8], strides = [1, 1]} : vector<8x64xbf16> to vector<8x8xbf16>
    %86 = vector.extract_strided_slice %19 {offsets = [0, 56], sizes = [8, 8], strides = [1, 1]} : vector<8x64xbf16> to vector<8x8xbf16>
    %cst_37 = arith.constant dense<0.000000e+00> : vector<8x8xf32>
    %87 = tpu.matmul %84, %85, %cst_37 {dimension_numbers = #tpu.dot_dimension_numbers<[1], [1], [0], [0], [0, 0, 1, 0], [], []>} : vector<8x8xbf16>, vector<8x8xbf16>, vector<8x8xf32> -> vector<8x8xf32>
    %cst_38 = arith.constant dense<0xFF800000> : vector<8xf32>
    %88 = vector.multi_reduction <maximumf>, %87, %cst_38 [1] : vector<8x8xf32> to vector<8xf32>
    %89 = vector.shape_cast %88 : vector<8xf32> to vector<8x1xf32>
    %90 = vector.broadcast %89 : vector<8x1xf32> to vector<8x8xf32>
    %91 = arith.subf %87, %90 : vector<8x8xf32>
    %92 = math.exp %91 : vector<8x8xf32>
    %cst_39 = arith.constant dense<0.000000e+00> : vector<8xf32>
    %93 = vector.multi_reduction <add>, %92, %cst_39 [1] : vector<8x8xf32> to vector<8xf32>
    %94 = vector.shape_cast %93 : vector<8xf32> to vector<8x1xf32>
    %95 = tpu.reciprocal %94 {approx = true} : vector<8x1xf32> -> vector<8x1xf32>
    %96 = vector.broadcast %95 : vector<8x1xf32> to vector<8x8xf32>
    %97 = arith.mulf %92, %96 : vector<8x8xf32>
    %98 = arith.truncf %97 : vector<8x8xf32> to vector<8x8xbf16>
    %cst_40 = arith.constant dense<0.000000e+00> : vector<8x8xf32>
    %99 = tpu.matmul %98, %86, %cst_40 {dimension_numbers = #tpu.dot_dimension_numbers<[1], [0], [0], [1], [0, 0, 1, 1], [], []>} : vector<8x8xbf16>, vector<8x8xbf16>, vector<8x8xf32> -> vector<8x8xf32>
    %100 = arith.truncf %99 : vector<8x8xf32> to vector<8x8xbf16>
    %c24 = arith.constant 24 : index
    %c0_41 = arith.constant 0 : index
    %101 = vector.load %arg8[%c24, %c0_41] : memref<32x32xbf16, #tpu.memory_space<vmem>>, vector<8x32xbf16>
    %cst_42 = arith.constant dense<0.000000e+00> : vector<8x32xf32>
    %102 = tpu.matmul %100, %101, %cst_42 {dimension_numbers = #tpu.dot_dimension_numbers<[1], [0], [0], [1], [0, 0, 1, 1], [], []>} : vector<8x8xbf16>, vector<8x32xbf16>, vector<8x32xf32> -> vector<8x32xf32>
    %103 = arith.addf %83, %102 : vector<8x32xf32>
    %104 = arith.addf %1, %103 : vector<8x32xf32>
    %c0_43 = arith.constant 0 : index
    %c0_44 = arith.constant 0 : index
    %105 = vector.load %arg10[%c0_43, %c0_44] : memref<1x32xf32, #tpu.memory_space<vmem>>, vector<1x32xf32>
    %c0_45 = arith.constant 0 : index
    %c0_46 = arith.constant 0 : index
    %106 = vector.load %arg11[%c0_45, %c0_46] : memref<1x32xf32, #tpu.memory_space<vmem>>, vector<1x32xf32>
    %cst_47 = arith.constant dense<0.000000e+00> : vector<8xf32>
    %107 = vector.multi_reduction <add>, %104, %cst_47 [1] : vector<8x32xf32> to vector<8xf32>
    %108 = vector.shape_cast %107 : vector<8xf32> to vector<8x1xf32>
    %cst_48 = arith.constant 3.200000e+01 : f32
    %109 = vector.broadcast %cst_48 : f32 to vector<8x1xf32>
    %110 = arith.divf %108, %109 : vector<8x1xf32>
    %111 = vector.broadcast %110 : vector<8x1xf32> to vector<8x32xf32>
    %112 = arith.subf %104, %111 : vector<8x32xf32>
    %113 = arith.mulf %112, %112 : vector<8x32xf32>
    %cst_49 = arith.constant dense<0.000000e+00> : vector<8xf32>
    %114 = vector.multi_reduction <add>, %113, %cst_49 [1] : vector<8x32xf32> to vector<8xf32>
    %115 = vector.shape_cast %114 : vector<8xf32> to vector<8x1xf32>
    %cst_50 = arith.constant 3.200000e+01 : f32
    %116 = vector.broadcast %cst_50 : f32 to vector<8x1xf32>
    %117 = arith.divf %115, %116 : vector<8x1xf32>
    %118 = vector.broadcast %110 : vector<8x1xf32> to vector<8x32xf32>
    %119 = arith.subf %104, %118 : vector<8x32xf32>
    %cst_51 = arith.constant 9.99999974E-6 : f32
    %120 = vector.broadcast %cst_51 : f32 to vector<8x1xf32>
    %121 = arith.addf %117, %120 : vector<8x1xf32>
    %122 = math.rsqrt %121 : vector<8x1xf32>
    %123 = vector.broadcast %122 : vector<8x1xf32> to vector<8x32xf32>
    %124 = arith.mulf %119, %123 : vector<8x32xf32>
    %125 = vector.broadcast %105 : vector<1x32xf32> to vector<8x32xf32>
    %126 = arith.mulf %124, %125 : vector<8x32xf32>
    %127 = vector.broadcast %106 : vector<1x32xf32> to vector<8x32xf32>
    %128 = arith.addf %126, %127 : vector<8x32xf32>
    %129 = arith.truncf %128 : vector<8x32xf32> to vector<8x32xbf16>
    %c0_52 = arith.constant 0 : index
    %c0_53 = arith.constant 0 : index
    %130 = vector.load %arg12[%c0_52, %c0_53] : memref<32x64xbf16, #tpu.memory_space<vmem>>, vector<32x64xbf16>
    %cst_54 = arith.constant dense<0.000000e+00> : vector<8x64xf32>
    %131 = tpu.matmul %129, %130, %cst_54 {dimension_numbers = #tpu.dot_dimension_numbers<[1], [0], [0], [1], [0, 0, 1, 1], [], []>} : vector<8x32xbf16>, vector<32x64xbf16>, vector<8x64xf32> -> vector<8x64xf32>
    %c0_55 = arith.constant 0 : index
    %c0_56 = arith.constant 0 : index
    %132 = vector.load %arg13[%c0_55, %c0_56] : memref<1x64xf32, #tpu.memory_space<vmem>>, vector<1x64xf32>
    %133 = vector.broadcast %132 : vector<1x64xf32> to vector<8x64xf32>
    %134 = arith.addf %131, %133 : vector<8x64xf32>
    %cst_57 = arith.constant 0.000000e+00 : f32
    %135 = vector.broadcast %cst_57 : f32 to vector<8x64xf32>
    %136 = arith.maximumf %134, %135 : vector<8x64xf32>
    %137 = arith.truncf %136 : vector<8x64xf32> to vector<8x64xbf16>
    %c0_58 = arith.constant 0 : index
    %c0_59 = arith.constant 0 : index
    %138 = vector.load %arg14[%c0_58, %c0_59] : memref<64x32xbf16, #tpu.memory_space<vmem>>, vector<64x32xbf16>
    %cst_60 = arith.constant dense<0.000000e+00> : vector<8x32xf32>
    %139 = tpu.matmul %137, %138, %cst_60 {dimension_numbers = #tpu.dot_dimension_numbers<[1], [0], [0], [1], [0, 0, 1, 1], [], []>} : vector<8x64xbf16>, vector<64x32xbf16>, vector<8x32xf32> -> vector<8x32xf32>
    %c0_61 = arith.constant 0 : index
    %c0_62 = arith.constant 0 : index
    %140 = vector.load %arg15[%c0_61, %c0_62] : memref<1x32xf32, #tpu.memory_space<vmem>>, vector<1x32xf32>
    %141 = vector.broadcast %140 : vector<1x32xf32> to vector<8x32xf32>
    %142 = arith.addf %139, %141 : vector<8x32xf32>
    %143 = arith.addf %128, %142 : vector<8x32xf32>
    %c0_63 = arith.constant 0 : index
    %c0_64 = arith.constant 0 : index
    %144 = vector.load %arg16[%c0_63, %c0_64] : memref<1x32xf32, #tpu.memory_space<vmem>>, vector<1x32xf32>
    %c0_65 = arith.constant 0 : index
    %c0_66 = arith.constant 0 : index
    %145 = vector.load %arg17[%c0_65, %c0_66] : memref<1x32xf32, #tpu.memory_space<vmem>>, vector<1x32xf32>
    %cst_67 = arith.constant dense<0.000000e+00> : vector<8xf32>
    %146 = vector.multi_reduction <add>, %143, %cst_67 [1] : vector<8x32xf32> to vector<8xf32>
    %147 = vector.shape_cast %146 : vector<8xf32> to vector<8x1xf32>
    %cst_68 = arith.constant 3.200000e+01 : f32
    %148 = vector.broadcast %cst_68 : f32 to vector<8x1xf32>
    %149 = arith.divf %147, %148 : vector<8x1xf32>
    %150 = vector.broadcast %149 : vector<8x1xf32> to vector<8x32xf32>
    %151 = arith.subf %143, %150 : vector<8x32xf32>
    %152 = arith.mulf %151, %151 : vector<8x32xf32>
    %cst_69 = arith.constant dense<0.000000e+00> : vector<8xf32>
    %153 = vector.multi_reduction <add>, %152, %cst_69 [1] : vector<8x32xf32> to vector<8xf32>
    %154 = vector.shape_cast %153 : vector<8xf32> to vector<8x1xf32>
    %cst_70 = arith.constant 3.200000e+01 : f32
    %155 = vector.broadcast %cst_70 : f32 to vector<8x1xf32>
    %156 = arith.divf %154, %155 : vector<8x1xf32>
    %157 = vector.broadcast %149 : vector<8x1xf32> to vector<8x32xf32>
    %158 = arith.subf %143, %157 : vector<8x32xf32>
    %cst_71 = arith.constant 9.99999974E-6 : f32
    %159 = vector.broadcast %cst_71 : f32 to vector<8x1xf32>
    %160 = arith.addf %156, %159 : vector<8x1xf32>
    %161 = math.rsqrt %160 : vector<8x1xf32>
    %162 = vector.broadcast %161 : vector<8x1xf32> to vector<8x32xf32>
    %163 = arith.mulf %158, %162 : vector<8x32xf32>
    %164 = vector.broadcast %144 : vector<1x32xf32> to vector<8x32xf32>
    %165 = arith.mulf %163, %164 : vector<8x32xf32>
    %166 = vector.broadcast %145 : vector<1x32xf32> to vector<8x32xf32>
    %167 = arith.addf %165, %166 : vector<8x32xf32>
    %c0_72 = arith.constant 0 : index
    %c0_73 = arith.constant 0 : index
    %c0_74 = arith.constant 0 : index
    %168 = vector.load %arg18[%c0_72, %c0_73, %c0_74] : memref<1x8x32xf32, #tpu.memory_space<vmem>>, vector<1x8x32xf32>
    %169 = vector.shape_cast %168 : vector<1x8x32xf32> to vector<8x32xf32>
    %170 = vector.shape_cast %167 : vector<8x32xf32> to vector<1x8x32xf32>
    tpu.vector_store %arg18[%c0_72, %c0_73, %c0_74], %170 {strides = array<i32>} : memref<1x8x32xf32, #tpu.memory_space<vmem>>, vector<1x8x32xf32>,
    return
  }
  func.func @transform_0(%arg0: i32, %arg1: i32) -> (i32, i32, i32) {
    %c0_i32 = arith.constant 0 : i32
    %c0_i32_0 = arith.constant 0 : i32
    return %arg0, %arg1, %c0_i32 : i32, i32, i32
  }
  func.func @transform_1(%arg0: i32, %arg1: i32) -> (i32, i32, i32) {
    %c0_i32 = arith.constant 0 : i32
    %c0_i32_0 = arith.constant 0 : i32
    %c0_i32_1 = arith.constant 0 : i32
    return %arg0, %c0_i32, %c0_i32_0 : i32, i32, i32
  }
  func.func @transform_2(%arg0: i32, %arg1: i32) -> (i32, i32) {
    %c0_i32 = arith.constant 0 : i32
    %c0_i32_0 = arith.constant 0 : i32
    %c0_i32_1 = arith.constant 0 : i32
    return %c0_i32, %c0_i32_0 : i32, i32
  }
  func.func @transform_3(%arg0: i32, %arg1: i32) -> (i32, i32) {
    %c0_i32 = arith.constant 0 : i32
    %c0_i32_0 = arith.constant 0 : i32
    %c0_i32_1 = arith.constant 0 : i32
    return %c0_i32, %c0_i32_0 : i32, i32
  }
  func.func @transform_4(%arg0: i32, %arg1: i32) -> (i32, i32) {
    %c0_i32 = arith.constant 0 : i32
    %c0_i32_0 = arith.constant 0 : i32
    %c0_i32_1 = arith.constant 0 : i32
    return %c0_i32, %c0_i32_0 : i32, i32
  }
  func.func @transform_5(%arg0: i32, %arg1: i32) -> (i32, i32) {
    %c0_i32 = arith.constant 0 : i32
    %c0_i32_0 = arith.constant 0 : i32
    %c0_i32_1 = arith.constant 0 : i32
    return %c0_i32, %c0_i32_0 : i32, i32
  }
  func.func @transform_6(%arg0: i32, %arg1: i32) -> (i32, i32) {
    %c0_i32 = arith.constant 0 : i32
    %c0_i32_0 = arith.constant 0 : i32
    %c0_i32_1 = arith.constant 0 : i32
    return %c0_i32, %c0_i32_0 : i32, i32
  }
  func.func @transform_7(%arg0: i32, %arg1: i32) -> (i32, i32) {
    %c0_i32 = arith.constant 0 : i32
    %c0_i32_0 = arith.constant 0 : i32
    %c0_i32_1 = arith.constant 0 : i32
    return %c0_i32, %c0_i32_0 : i32, i32
  }
  func.func @transform_8(%arg0: i32, %arg1: i32) -> (i32, i32) {
    %c0_i32 = arith.constant 0 : i32
    %c0_i32_0 = arith.constant 0 : i32
    %c0_i32_1 = arith.constant 0 : i32
    return %c0_i32, %c0_i32_0 : i32, i32
  }
  func.func @transform_9(%arg0: i32, %arg1: i32) -> (i32, i32) {
    %c0_i32 = arith.constant 0 : i32
    %c0_i32_0 = arith.constant 0 : i32
    %c0_i32_1 = arith.constant 0 : i32
    return %c0_i32, %c0_i32_0 : i32, i32
  }
  func.func @transform_10(%arg0: i32, %arg1: i32) -> (i32, i32) {
    %c0_i32 = arith.constant 0 : i32
    %c0_i32_0 = arith.constant 0 : i32
    %c0_i32_1 = arith.constant 0 : i32
    return %c0_i32, %c0_i32_0 : i32, i32
  }
  func.func @transform_11(%arg0: i32, %arg1: i32) -> (i32, i32) {
    %c0_i32 = arith.constant 0 : i32
    %c0_i32_0 = arith.constant 0 : i32
    %c0_i32_1 = arith.constant 0 : i32
    return %c0_i32, %c0_i32_0 : i32, i32
  }
  func.func @transform_12(%arg0: i32, %arg1: i32) -> (i32, i32) {
    %c0_i32 = arith.constant 0 : i32
    %c0_i32_0 = arith.constant 0 : i32
    %c0_i32_1 = arith.constant 0 : i32
    return %c0_i32, %c0_i32_0 : i32, i32
  }
  func.func @transform_13(%arg0: i32, %arg1: i32) -> (i32, i32) {
    %c0_i32 = arith.constant 0 : i32
    %c0_i32_0 = arith.constant 0 : i32
    %c0_i32_1 = arith.constant 0 : i32
    return %c0_i32, %c0_i32_0 : i32, i32
  }
  func.func @transform_14(%arg0: i32, %arg1: i32) -> (i32, i32) {
    %c0_i32 = arith.constant 0 : i32
    %c0_i32_0 = arith.constant 0 : i32
    %c0_i32_1 = arith.constant 0 : i32
    return %c0_i32, %c0_i32_0 : i32, i32
  }
  func.func @transform_15(%arg0: i32, %arg1: i32) -> (i32, i32) {
    %c0_i32 = arith.constant 0 : i32
    %c0_i32_0 = arith.constant 0 : i32
    %c0_i32_1 = arith.constant 0 : i32
    return %c0_i32, %c0_i32_0 : i32, i32
  }
  func.func @transform_16(%arg0: i32, %arg1: i32) -> (i32, i32, i32) {
    %c0_i32 = arith.constant 0 : i32
    %c0_i32_0 = arith.constant 0 : i32
    return %arg0, %arg1, %c0_i32 : i32, i32, i32
  }
}

</mosaic_0001>

<bundles_post_ra>
// kernel: tpu_custom_call.1
= control target key start
LH: loop header
LB: loop body
LE: loop exit
PB: predicated region body
PF: predicated region fallthrough
CT: control target
= control target key end

     0   :  { %s2913_s0 = inlined_call_operand.vmem [shape: f32[2,8,32], index: 0, kind: input, shape index: {}]   ;;  %s2914_s1 = inlined_call_operand.vmem [shape: f32[2,8,32], index: 1, kind: input, shape index: {}]   ;;  %s2915_s2 = inlined_call_operand.vmem [shape: bf16[32,32], index: 2, kind: input, shape index: {}]   ;;  %s2916_s3 = inlined_call_operand.hbm [shape: f32[1,32], index: 3, kind: input, shape index: {}]   ;;  %s2917_s4 = inlined_call_operand.hbm [shape: bf16[32,64], index: 4, kind: input, shape index: {}]   ;;  %s2918_s5 = inlined_call_operand.hbm [shape: f32[1,64], index: 5, kind: input, shape index: {}]   ;;  %s2919_s6 = inlined_call_operand.hbm [shape: bf16[32,32], index: 6, kind: input, shape index: {}]   ;;  %s2920_s7 = inlined_call_operand.hbm [shape: f32[1,32], index: 7, kind: input, shape index: {}]   ;;  %s2921_s8 = inlined_call_operand.hbm [shape: f32[1,32], index: 8, kind: input, shape index: {}]   ;;  %s2922_s9 = inlined_call_operand.hbm [shape: f32[1,32], index: 9, kind: input, shape index: {}]   ;;  %s2923_s10 = inlined_call_operand.vmem [shape: bf16[32,64], index: 10, kind: input, shape index: {}]   ;;  %s2924_s11 = inlined_call_operand.vmem [shape: f32[1,64], index: 11, kind: input, shape index: {}]   ;;  %s2925_s12 = inlined_call_operand.vmem [shape: bf16[64,32], index: 12, kind: input, shape index: {}]   ;;  %s2926_s13 = inlined_call_operand.vmem [shape: f32[1,32], index: 13, kind: input, shape index: {}]   ;;  %s2927_s14 = inlined_call_operand.vmem [shape: f32[1,32], index: 14, kind: input, shape index: {}]   ;;  %s2928_s15 = inlined_call_operand.vmem [shape: f32[1,32], index: 15, kind: input, shape index: {}]   ;;  %s2929_s16 = inlined_call_operand.hbm [shape: f32[2,8,32], index: 16, kind: output, shape index: {}]  }
   0x1   :  { %2942 = sst [smem:[#allocation27_spill]] %s2913_s0 }
   0x2   :  { %2943 = sst [smem:[#allocation28_spill]] %s2914_s1 }
   0x3   :  { %2944 = sst [smem:[#allocation29_spill]] %s2928_s15 }
   0x4   :  { %2945 = sst [smem:[#allocation30_spill]] %s2929_s16 }
   0x5   :  { %21 = vsyncpa [#allocation3], 0 }
   0x6   :  { %22 = vsyncpa [#allocation6], 0 }
   0x7   :  { %23 = vsyncpa [#allocation9], 0 }
   0x8   :  { %24 = vsyncpa [#allocation12], 0 }
   0x9   :  { %25 = vsyncpa [#allocation4], 0 }
   0xa   :  { %27 = vsyncpa [#allocation4 + $0x1], 0  ;;  %s2571_s21 = smov 0   ;;  %s2573_s22 = smov 0  }
   0xb   :  { %s2575_s23 = smov 0   ;;  %s2577_s24 = smov 0  }
   0xc   :  { %s2579_s25 = smov 0   ;;  %s2581_s26 = smov 0  }
   0xd LB: > { %2946 = sst [smem:[#allocation20_spill]] %s2445_s21  ;;  %s1817_s27 = sadd.s32 4294967295, %s2465_s26   ;;  %s2465_s26 = sphi %s2581_s26, %s33_s26   ;;  %s2461_s25 = sphi %s2579_s25, %s2973_s25   ;;  %s2457_s24 = sphi %s2577_s24, %s2976_s24   ;;  %s2453_s23 = sphi %s2575_s23, %s2971_s23   ;;  %s2449_s22 = sphi %s2573_s22, %s2975_s22   ;;  %s2445_s21 = sphi %s2571_s21, %s2974_s21  }
   0xe   : > { %2947 = sst [smem:[#allocation21_spill]] %s2453_s23  ;;  %s1818_s28 = sadd.s32 4294967294, %s2465_s26  }
   0xf   : > { %2948 = sst [smem:[#allocation22_spill]] %s2461_s25  ;;  %s45_s29 = sadd.s32 1, %s2461_s25 }
  0x10   : > { %2949 = sst [smem:[#allocation23_spill]] %s2465_s26  ;;  %s402_s30 = sadd.s32 1, %s2453_s23 }
  0x11   : > { %p47_p0 = scmp.ge.s32.totalorder %s45_s29, 2  ;;  %p412_p1 = scmp.ne.s32.totalorder %s2453_s23, %s2449_s22 }
  0x12   : > { %p413_p2 = scmp.eq.s32.totalorder %s1817_s27, 1  ;;  %p418_p3 = scmp.ne.s32.totalorder %s2449_s22, %s2445_s21 }
  0x13   : > { %s2978_s29 = smov (%p47_p0, %s45_s29), 0  ;;  %p419_p5 = scmp.eq.s32.totalorder %s1818_s28, 1 }
  0x14   : > { %2950 = sst [smem:[#allocation24_spill]] %s2978_s29  ;;  %p2611_p4 = por %p413_p2, %p412_p1 }
  0x15   : > { %s397_s17 = ssub.s32 %s2461_s25, %s2978_s29  ;;  %p1819_p6 = scmp.ge.s32.totalorder %s2465_s26, 1 }
  0x16   : > { %s2951_s0 = scalar_select %p2611_p4, 1, 0 }
  0x17   : > { %p400_p7 = scmp.eq.s32.totalorder %s397_s17, 0  ;;  %p2618_p8 = por %p419_p5, %p418_p3 }
  0x18   : > { %p426_p9 = scmp.lt.s32.totalorder %s2465_s26, 3  ;;  %p2630_p11 = scmp.eq.s32.totalorder %s1817_s27, 0 }
  0x19   : > { %s2952_s18 = scalar_select %p2618_p8, 1, 0 }
  0x1a   : > { %s2624_s19 = scalar_select %p400_p7, %s2453_s23, %s402_s30  }
  0x1b   : > { %2953 = sst [smem:[#allocation25_spill]] %s2952_s18  ;;  %p2626_p10 = pnand %p1819_p6, %p426_p9 }
  0x1c   : > { %2954 = sst [smem:[#allocation26_spill]] %s2624_s19  ;;  %s2467_s28 = smov [#allocation5]  }
  0x1d   : > { %s2955_s20 = scalar_select %p2626_p10, 1, 0 }
  0x1e   : > { %s2956_s21 = scalar_select %p2630_p11, 1, 0 }
  0x1f   : > { %p2054_p12 = pneg %p2626_p10  ;;  %s452_s17 = sshll.u32 %s2467_s28, 4  ;;  %s453_s17 = int_to_ptr.vmem [resolvable:$true] %s452_s17 }
  0x20   : > { %s2468_s30 = smov [#allocation8]   ;;  %s2202_s19 = scalar_lea.vmem %s453_s17, 256 }
  0x21   : > { %p2638_p13 = pnand %p2630_p11, %p2054_p12  ;;  %s476_s25 = sshll.u32 %s2468_s30, 4  ;;  %s477_s25 = int_to_ptr.vmem [resolvable:$true] %s476_s25 }
  0x22   : > { %p2203_p1 = scmp.ne.s32.totalorder %s453_s17, %s2202_s19  ;;  %p2210_p5 = scmp.lt.s32.totalorder %s453_s17, %s453_s17 }
  0x23   : > { %p2644_p0 = pneg %p2638_p13  ;;  %p2211_p6 = scmp.lt.s32.totalorder %s2202_s19, %s2202_s19 }
  0x25   : > { %p2205_p2 = pnand %p2203_p1, %p2644_p0  ;;  %p2212_p7 = por %p2211_p6, %p2210_p5 }
  0x27   : > { %p2206_p3 = pneg %p2205_p2 }
  0x29   : > { %p2213_p9 = pnand %p2212_p7, %p2206_p3 }
  0x2b   : > { %2216 = shalt.err (!%p2213_p9)
}
  0x2c   : > { %s2469_s28 = smov 64   ;;  %s2470_s30 = smov 4  }
  0x2d   : > { %2060 = dma.hbm_to_vmem [thread:$0]  (!%p2638_p13), %s2917_s4, 256, %s453_s17, [#allocation6], %s2469_s28, %s2469_s28, %s2470_s30  }
  0x2e   : > { %s2228_s26 = scalar_lea.vmem %s477_s25, 256  ;;  %p2236_p2 = scmp.lt.s32.totalorder %s477_s25, %s477_s25 }
  0x2f   : > { %p2229_p12 = scmp.ne.s32.totalorder %s477_s25, %s2228_s26  ;;  %p2237_p4 = scmp.lt.s32.totalorder %s2228_s26, %s2228_s26 }
  0x31   : > { %p2231_p8 = pnand %p2229_p12, %p2644_p0  ;;  %p2238_p11 = por %p2237_p4, %p2236_p2 }
  0x33   : > { %p2232_p1 = pneg %p2231_p8 }
  0x35   : > { %p2239_p5 = pnand %p2238_p11, %p2232_p1 }
  0x37   : > { %2242 = shalt.err (!%p2239_p5)
}
  0x38   : > { %2066 = dma.hbm_to_vmem [thread:$0]  (!%p2638_p13), %s2919_s6, 256, %s477_s25, [#allocation9], %s2469_s28, %s2469_s28, %s2470_s30  }
  0x39   : > { %s2471_s15 = smov [#allocation11]  }
  0x3a   : > { %s501_s23 = sshll.u32 %s2471_s15, 4  ;;  %s502_s23 = int_to_ptr.vmem [resolvable:$true] %s501_s23 }
  0x3b   : > { %s2254_s18 = scalar_lea.vmem %s502_s23, 16  ;;  %s2261_s17 = scalar_lea.vmem %s502_s23, 32 }
  0x3c   : > { %p2255_p3 = scmp.ne.s32.totalorder %s502_s23, %s2254_s18  ;;  %p2262_p7 = scmp.lt.s32.totalorder %s502_s23, %s502_s23 }
  0x3d   : > { %p2263_p4 = scmp.lt.s32.totalorder %s2261_s17, %s2254_s18 }
  0x3e   : > { %p2257_p6 = pnand %p2255_p3, %p2644_p0 }
  0x3f   : > { %p2264_p11 = por %p2263_p4, %p2262_p7 }
  0x40   : > { %p2258_p8 = pneg %p2257_p6 }
  0x42   : > { %p2265_p9 = pnand %p2264_p11, %p2258_p8 }
  0x44   : > { %2268 = shalt.err (!%p2265_p9)
}
  0x45   : > { %2072 = dma.hbm_to_vmem [thread:$0]  (!%p2638_p13), %s2921_s8, 16, %s502_s23, [#allocation12]  }
  0x46   : > { %s2472_s15 = smov [#allocation2]   ;;  %s2473_s28 = smov [#allocation7]  }
  0x47   : > { %s442_s25 = sshll.u32 %s2472_s15, 4  ;;  %s466_s30 = sshll.u32 %s2473_s28, 4  ;;  %s443_s25 = int_to_ptr.vmem [resolvable:$true] %s442_s25  ;;  %s467_s30 = int_to_ptr.vmem [resolvable:$true] %s466_s30 }
  0x48   : > { %s2280_s19 = scalar_lea.vmem %s443_s25, 16  ;;  %s2287_s18 = scalar_lea.vmem %s443_s25, 32 }
  0x49   : > { %p2281_p12 = scmp.ne.s32.totalorder %s443_s25, %s2280_s19  ;;  %p2288_p5 = scmp.lt.s32.totalorder %s443_s25, %s443_s25 }
  0x4a   : > { %p2289_p3 = scmp.lt.s32.totalorder %s2287_s18, %s2280_s19 }
  0x4b   : > { %p2283_p1 = pnand %p2281_p12, %p2644_p0 }
  0x4c   : > { %p2290_p6 = por %p2289_p3, %p2288_p5 }
  0x4d   : > { %p2284_p2 = pneg %p2283_p1 }
  0x4f   : > { %p2291_p8 = pnand %p2290_p6, %p2284_p2 }
  0x51   : > { %2294 = shalt.err (!%p2291_p8)
}
  0x52   : > { %2057 = dma.hbm_to_vmem [thread:$0]  (!%p2638_p13), %s2916_s3, 16, %s443_s25, [#allocation3]  }
  0x53   : > { %s2306_s26 = scalar_lea.vmem %s467_s30, 16  ;;  %s2313_s16 = scalar_lea.vmem %s467_s30, 32 }
  0x54   : > { %p2307_p7 = scmp.ne.s32.totalorder %s467_s30, %s2306_s26  ;;  %p2314_p9 = scmp.lt.s32.totalorder %s467_s30, %s467_s30 }
  0x55   : > { %p2315_p12 = scmp.lt.s32.totalorder %s2313_s16, %s2306_s26 }
  0x56   : > { %p2309_p4 = pnand %p2307_p7, %p2644_p0 }
  0x57   : > { %p2316_p1 = por %p2315_p12, %p2314_p9 }
  0x58   : > { %p2310_p11 = pneg %p2309_p4 }
  0x5a   : > { %p2317_p10 = pnand %p2316_p1, %p2310_p11 }
  0x5c   : > { %2320 = shalt.err (!%p2317_p10)
}
  0x5d   : > { %2063 = dma.hbm_to_vmem [thread:$0]  (!%p2638_p13), %s2918_s5, 16, %s467_s30, [#allocation6]  }
  0x5e   : > { %s2474_s19 = smov [#allocation10]   ;;  %s2475_s18 = smov [#allocation13]  }
  0x5f   : > { %s490_s25 = sshll.u32 %s2474_s19, 4  ;;  %s512_s23 = sshll.u32 %s2475_s18, 4  ;;  %s491_s25 = int_to_ptr.vmem [resolvable:$true] %s490_s25  ;;  %s513_s23 = int_to_ptr.vmem [resolvable:$true] %s512_s23 }
  0x60   : > { %s2332_s17 = scalar_lea.vmem %s491_s25, 16  ;;  %s2339_s26 = scalar_lea.vmem %s491_s25, 32 }
  0x61   : > { %p2333_p2 = scmp.ne.s32.totalorder %s491_s25, %s2332_s17  ;;  %p2340_p10 = scmp.lt.s32.totalorder %s491_s25, %s491_s25 }
  0x62   : > { %p2341_p6 = scmp.lt.s32.totalorder %s2339_s26, %s2332_s17 }
  0x63   : > { %p2335_p5 = pnand %p2333_p2, %p2644_p0 }
  0x64   : > { %p2342_p8 = por %p2341_p6, %p2340_p10 }
  0x65   : > { %p2336_p3 = pneg %p2335_p5 }
  0x67   : > { %p2343_p7 = pnand %p2342_p8, %p2336_p3 }
  0x69   : > { %2346 = shalt.err (!%p2343_p7)
}
  0x6a   : > { %2069 = dma.hbm_to_vmem [thread:$0]  (!%p2638_p13), %s2920_s7, 16, %s491_s25, [#allocation9]  }
  0x6b   : > { %s2358_s15 = scalar_lea.vmem %s513_s23, 16  ;;  %s2365_s28 = scalar_lea.vmem %s513_s23, 32 }
  0x6c   : > { %p2359_p4 = scmp.ne.s32.totalorder %s513_s23, %s2358_s15  ;;  %p2366_p12 = scmp.lt.s32.totalorder %s513_s23, %s513_s23 }
  0x6d   : > { %p2367_p1 = scmp.lt.s32.totalorder %s2365_s28, %s2358_s15 }
  0x6e   : > { %p2361_p11 = pnand %p2359_p4, %p2644_p0 }
  0x6f   : > { %p2368_p2 = por %p2367_p1, %p2366_p12 }
  0x70   : > { %p2362_p9 = pneg %p2361_p11 }
  0x72   : > { %p2369_p5 = pnand %p2368_p2, %p2362_p9 }
  0x74   : > { %2372 = shalt.err (!%p2369_p5)
}
  0x75   : > { %2075 = dma.hbm_to_vmem [thread:$0]  (!%p2638_p13), %s2922_s9, 16, %s513_s23, [#allocation12]  }
  0x76   : > { %p2959_p3 = scmp.ne.s32.totalorder %s2955_s20, 0 }
  0x77   : > { %p2960_p10 = scmp.ne.s32.totalorder (!%p2959_p3), %s2956_s21, 0 }
  0x78   : > { %560 = sbr.rel (%p2959_p3) target bundleno = 3819 (0xeeb), region = 84 }
  0x7d   : > { %2424 = dma.done.wait (%p2960_p10), [#allocation3], 16  }
  0x7e   : > { %2426 = vsyncadd (%p2960_p10), [#allocation3], 4294967280 }
  0x7f   : > { %2428 = dma.done.wait (%p2960_p10), [#allocation6], 272  }
  0x80   : > { %2430 = vsyncadd (%p2960_p10), [#allocation6], 4294967024 }
  0x81   : > { %2432 = dma.done.wait (%p2960_p10), [#allocation9], 272  }
  0x82   : > { %2434 = vsyncadd (%p2960_p10), [#allocation9], 4294967024 }
  0x83   : > { %2436 = dma.done.wait (%p2960_p10), [#allocation12], 32  }
  0x84   : > { %2438 = vsyncadd (%p2960_p10), [#allocation12], 4294967264  ;;  %p640_p13 = scmp.lt.s32.totalorder %s2457_s24, 1  ;;  %v2476_v0 = vmov 0.0   ;;  %vm2477_vm0 = vmmov 0   ;;  %v2161_v1 = vld [vmem:[#allocation5 + $0x8] sm:$0xff]  }
  0x85   : > { %1924 = vmatprep.subr.bf16.mxu1 %v2476_v0  ;;  %1916 = vmatprep.subr.bf16.mxu0 %v2476_v0  ;;  %v2162_v2 = vld [vmem:[%s2915_s2 + $0x8] sm:$0xff]   ;;  %s2961_s1 = sld [smem:[#allocation28_spill]]  ;;  %v2164_v4 = vld [vmem:[%s2915_s2] sm:$0xff]   ;;  %vm679_vm1 = vcmask 261120   ;;  %v1843_v9 = vld [vmem:[#allocation7] ss:$0 sm:$0xff] }
  0x86   : > { %1928 = vmatprep.mubr.msk.bf16.mxu1 %vm2477_vm0, %v2476_v0  ;;  %1920 = vmatprep.mubr.msk.bf16.mxu0 %vm2477_vm0, %v2476_v0  ;;  %s641_s29 = scalar_select %p640_p13, %s2457_s24, 1  ;;  %v2163_v3 = vld [vmem:[#allocation5] sm:$0xff]   ;;  %v1839_v10 = vld [vmem:[#allocation2] ss:$0 sm:$0xff]  ;;  %vm800_vm2 = vcmask 64512   ;;  %vm865_vm3 = vcmask 1043456  }
  0x87   : > { %s2962_s16 = sld [smem:[#allocation27_spill]]  ;;  %1925 = vmatpush3.bf16.msra.mxu1 %v2161_v1  ;;  %1917 = vmatpush3.bf16.msra.mxu0 %v2162_v2  ;;  %s2478_s18 = smov 96   ;;  %v910_v44 = vld [vmem:[#allocation8] sm:$0xf]  ;;  %vm1575_vm4 = vcmask 523264  }
  0x88   : > { %s1837_s20 = sshll.u32 %s641_s29, 3  ;;  %1926 = vmatprep.subr.bf16.mxu1 %v2476_v0  ;;  %1918 = vmatprep.subr.bf16.mxu0 %v2476_v0  ;;  %s2479_s29 = smov 120   ;;  %v915_v45 = vsel %vm865_vm3, %v910_v44, 0 }
  0x89   : > { %s2481_s21 = smov 112   ;;  %s2482_s27 = smov 80  }
  0x8a   : > { %s2483_s25 = smov 104   ;;  %s2484_s23 = smov 72  }
  0x8b   : > { %s650_s17 = scalar_lea.vmem %s2961_s1, %s1837_s20  ;;  %1927 = vmatpush3.bf16.msra.mxu1 %v2163_v3  ;;  %1919 = vmatpush3.bf16.msra.mxu0 %v2164_v4  ;;  %s637_s30 = sand.u32 1, %s2449_s22  }
  0x8c   : > { %v653_v5 = vld [vmem:[%s650_s17] sm:$0xff]  ;;  %1938 = vmatprep.subr.bf16.mxu1 %v2476_v0  ;;  %1932 = vmatprep.subr.bf16.mxu0 %v2476_v0  ;;  %s2964_s17 = sld [smem:[#allocation30_spill]]  ;;  %s1651_s1 = scalar_lea.sflag [#allocation4], %s637_s30 }
  0x8d   : > { %s646_s15 = scalar_lea.vmem %s2962_s16, %s1837_s20  ;;  %v655_v7 = vpack.c.bf16 %v653_v5, %v653_v5  ;;  %s2480_s20 = smov 88  }
  0x8e   : > { %v2737_v6 = vld [vmem:[%s646_s15] sm:$0xff]  ;;  %s1836_s16 = sshll.u32 %s637_s30, 3  ;;  %p2965_p6 = scmp.ne.s32.totalorder %s2951_s0, 0 }
  0x8f   : > { %v654_v8 = vpack.c.bf16 %v2737_v6, %v2737_v6  ;;  %1929 = vmatmul.mubr.msk.bf16.vlgmr.msra.gmra.mxu1 %vm679_vm1, %v655_v7  ;;  %s2485_s28 = smov [#allocation14]  }
  0x90   : > { %1940 = vmatprep.mubr.msk.bf16.mxu1 %vm2477_vm0, %v2476_v0  ;;  %s2377_s19 = sshll.u32 %s2485_s28, 4  ;;  %s2378_s19 = int_to_ptr.vmem [resolvable:$false] %s2377_s19 }
  0x91   : > { %1921 = vmatmul.mubr.msk.bf16.vlgmr.msra.gmra.mxu0 %vm679_vm1, %v654_v8 }
  0x92   : > { %1934 = vmatprep.mubr.msk.bf16.mxu0 %vm2477_vm0, %v2476_v0 }
 0x14f   : > { %v784_v11 = vpop.f32.mrf.mxu1 }
 0x150   : > { %v785_v12 = vadd.f32 %v1843_v9, %v784_v11 }
 0x151   : > { %v717_v13 = vpop.f32.mrf.mxu0  ;;  %v1930_v15 = vpop.f32.mrf.mxu1 }
 0x152   : > { %v718_v14 = vadd.f32 %v1839_v10, %v717_v13  ;;  %v2749_v16 = vpack.c.bf16 %v785_v12, %v785_v12  ;;  %v1070_v12 = vld [vmem:[#allocation8 + $0x4] sm:$0xf] }
 0x153   : > { %v1922_v17 = vpop.f32.mrf.mxu0  ;;  %v787_v18 = vpop.f32.mrf.mxu1  ;;  %v1075_v13 = vsel %vm865_vm3, %v1070_v12, 0 }
 0x154   : > { %v723_v19 = vmul.f32 0.35355338, %v718_v14  ;;  %860 = vrot.lane.b32.xlu1 %v2749_v16, %s2478_s18  ;;  %v805_v21 = vsel %vm800_vm2, %v2749_v16, 0 }
 0x155   : > { %v720_v20 = vpop.f32.mrf.mxu0  ;;  %v1931_v22 = vpop.f32.mrf.mxu1  ;;  %1933 = vmatpush3.bf16.xpose.msra.mxu0 %v805_v21 }
 0x156   : > { %1944 = vmatprep.subr.bf16.mxu0 %v2476_v0  ;;  %v2755_v24 = vpack.c.bf16 %v723_v19, %v723_v19 }
 0x157   : > { %v1923_v23 = vpop.f32.mrf.mxu0 }
 0x158   : > { %961 = vrot.lane.b32.xlu1 %v2749_v16, %s2479_s29 }
 0x15c   : > { %1935 = vmatmul.mubr.msk.bf16.vlgmr.msra.gmra.mxu0 %vm800_vm2, %v2755_v24 }
 0x15d   : > { %1946 = vmatprep.mubr.msk.bf16.mxu0 %vm2477_vm0, %v2476_v0  ;;  %1945 = vmatpush3.bf16.msra.mxu0 %v915_v45 }
 0x15e   : > { %1956 = vmatprep.subr.bf16.mxu0 %v2476_v0 }
 0x1c6   : > { %v861_v25 = vpop.permute.xlu1 %860 }
 0x1c7   : > { %v867_v26 = vsel %vm865_vm3, %v861_v25, 0 }
 0x1c8   : > { %1939 = vmatpush3.bf16.msra.mxu1 %v867_v26 }
 0x1c9   : > { %1950 = vmatprep.subr.bf16.mxu1 %v2476_v0 }
 0x1ca   : > { %v962_v40 = vpop.permute.xlu1 %961 }
 0x1cb   : > { %v967_v42 = vsel %vm800_vm2, %v962_v40, 0 }
 0x21c   : > { %v841_v27 = vpop.f32.mrf.mxu0 }
 0x21d   : > { %v847_v28 = vsel %vm800_vm2, %v841_v27, -inf }
 0x21e   : > { %848 = vmax.xlane.f32.xlu0 %v847_v28  ;;  %v1936_v29 = vpop.f32.mrf.mxu0 }
 0x220   : > { %v844_v30 = vpop.f32.mrf.mxu0 }
 0x222   : > { %v1937_v31 = vpop.f32.mrf.mxu0 }
 0x2a7   : > { %v849_v32 = vpop.xlane.xlu0 %848 }
 0x2a8   : > { %v850_v33 = vsub.f32 %v841_v27, %v849_v32 }
 0x2aa   : > { %v851_v34 = vmul.f32 1.442695, %v850_v33  ;;  %v1847_v33 = vld [vmem:[#allocation10] ss:$0 sm:$0xff] }
 0x2ac   : > { %2171 = vpow2.f32 %v851_v34 }
 0x2b9   : > { %v2172_v35 = vpop.eup %2171 }
 0x2ba   : > { %v853_v36 = vsel %vm800_vm2, %v2172_v35, 0.0 }
 0x2bb   : > { %854 = vadd.xlane.f32.xlu0 %v853_v36 }
 0x2d1   : > { %959 = vrot.lane.b32.xlu0 %v2755_v24, %s2479_s29  ;;  %s2963_s29 = sld [smem:[#allocation29_spill]] }
 0x344   : > { %v855_v37 = vpop.xlane.xlu0 %854 }
 0x345   : > { %2173 = vrcp.f32 %v855_v37 }
 0x348   : > { %v960_v43 = vpop.permute.xlu0 %959 }
 0x352   : > { %v2174_v38 = vpop.eup %2173 }
 0x353   : > { %v857_v39 = vmul.f32 %v2174_v38, %v2172_v35 }
 0x355   : > { %v858_v41 = vpack.c.bf16 %v857_v39, %v857_v39 }
 0x357   : > { %1941 = vmatmul.mubr.msk.bf16.vlgmr.msra.gmra.mxu1 %vm800_vm2, %v858_v41 }
 0x358   : > { %1951 = vmatpush3.bf16.xpose.msra.mxu1 %v967_v42  ;;  %1952 = vmatprep.mubr.msk.bf16.mxu1 %vm2477_vm0, %v2476_v0 }
 0x359   : > { %1962 = vmatprep.subr.bf16.mxu1 %v2476_v0 }
 0x35f   : > { %1953 = vmatmul.mubr.msk.bf16.vlgmr.msra.gmra.mxu1 %vm800_vm2, %v960_v43 }
 0x360   : > { %1964 = vmatprep.mubr.msk.bf16.mxu1 %vm2477_vm0, %v2476_v0  ;;  %1963 = vmatpush3.bf16.msra.mxu1 %v1075_v13 }
 0x361   : > { %1974 = vmatprep.subr.bf16.mxu1 %v2476_v0 }
 0x417   : > { %v903_v46 = vpop.f32.mrf.mxu1 }
 0x418   : > { %v909_v47 = vpack.c.bf16 %v903_v46, %v903_v46  ;;  %v1229_v46 = vld [vmem:[#allocation8 + $0x8] sm:$0xf] }
 0x419   : > { %v1942_v48 = vpop.f32.mrf.mxu1 }
 0x41a   : > { %1947 = vmatmul.mubr.msk.bf16.vlgmr.msra.gmra.mxu0 %vm800_vm2, %v909_v47  ;;  %v1234_v47 = vsel %vm865_vm3, %v1229_v46, 0  ;;  %v1862_v46 = vld [vmem:[%s2924_s11] ss:$0 sm:$0xff] }
 0x41b   : > { %v906_v49 = vpop.f32.mrf.mxu1  ;;  %1958 = vmatprep.mubr.msk.bf16.mxu0 %vm2477_vm0, %v2476_v0 }
 0x41d   : > { %v1943_v50 = vpop.f32.mrf.mxu1 }
 0x41f   : > { %v1003_v51 = vpop.f32.mrf.mxu1 }
 0x420   : > { %v1009_v52 = vsel %vm800_vm2, %v1003_v51, -inf }
 0x421   : > { %1010 = vmax.xlane.f32.xlu1 %v1009_v52  ;;  %v1954_v53 = vpop.f32.mrf.mxu1 }
 0x423   : > { %v1006_v54 = vpop.f32.mrf.mxu1 }
 0x425   : > { %v1955_v55 = vpop.f32.mrf.mxu1 }
 0x432   : > { %1021 = vrot.lane.b32.xlu1 %v2749_v16, %s2480_s20  ;;  %s1875_s20 = sshll.u32 %s2457_s24, 7  ;;  %s2379_s24 = scalar_lea.vmem %s2378_s19, 256 }
 0x433   : > { %s1663_s26 = scalar_lea.hbm %s2964_s17, %s1875_s20 }
 0x436   : > { %1118 = vrot.lane.b32.xlu1 %v2755_v24, %s2481_s21 }
 0x4aa   : > { %v1011_v56 = vpop.xlane.xlu1 %1010 }
 0x4ab   : > { %v1012_v57 = vsub.f32 %v1003_v51, %v1011_v56 }
 0x4ad   : > { %v1013_v58 = vmul.f32 1.442695, %v1012_v57 }
 0x4ae   : > { %v1022_v59 = vpop.permute.xlu1 %1021 }
 0x4af   : > { %2175 = vpow2.f32 %v1013_v58  ;;  %v1027_v60 = vsel %vm865_vm3, %v1022_v59, 0 }
 0x4b0   : > { %1957 = vmatpush3.bf16.msra.mxu0 %v1027_v60 }
 0x4b1   : > { %1968 = vmatprep.subr.bf16.mxu0 %v2476_v0 }
 0x4b2   : > { %v1119_v11 = vpop.permute.xlu1 %1118 }
 0x4bc   : > { %v2176_v61 = vpop.eup %2175 }
 0x4bd   : > { %v1015_v62 = vsel %vm800_vm2, %v2176_v61, 0.0 }
 0x4be   : > { %1016 = vadd.xlane.f32.xlu0 %v1015_v62 }
 0x4d4   : > { %1120 = vrot.lane.b32.xlu0 %v2749_v16, %s2481_s21  ;;  %s639_s21 = scalar_lea.vmem [#allocation14], %s1836_s16 }
 0x4da   : > { %v951_v63 = vpop.f32.mrf.mxu0 }
 0x4db   : > { %v957_v34 = vadd.f32 %v1847_v33, %v951_v63  ;;  %v2167_v33 = vld [vmem:[%s2925_s12 + $0x18] sm:$0xff]  }
 0x4dc   : > { %v1948_v1 = vpop.f32.mrf.mxu0 }
 0x4de   : > { %v954_v2 = vpop.f32.mrf.mxu0 }
 0x4e0   : > { %v1949_v3 = vpop.f32.mrf.mxu0 }
 0x4e1   : > { %v1388_v3 = vld [vmem:[#allocation8 + $0xc] sm:$0xf] }
 0x547   : > { %v1017_v4 = vpop.xlane.xlu0 %1016 }
 0x548   : > { %2177 = vrcp.f32 %v1017_v4 }
 0x54b   : > { %v1121_v8 = vpop.permute.xlu0 %1120 }
 0x54c   : > { %v1126_v10 = vsel %vm800_vm2, %v1121_v8, 0 }
 0x555   : > { %v2178_v5 = vpop.eup %2177 }
 0x556   : > { %v1019_v7 = vmul.f32 %v2178_v5, %v2176_v61  ;;  %v1393_v5 = vsel %vm865_vm3, %v1388_v3, 0 }
 0x558   : > { %v1020_v9 = vpack.c.bf16 %v1019_v7, %v1019_v7 }
 0x55a   : > { %1959 = vmatmul.mubr.msk.bf16.vlgmr.msra.gmra.mxu0 %vm800_vm2, %v1020_v9 }
 0x55b   : > { %1969 = vmatpush3.bf16.xpose.msra.mxu0 %v1126_v10  ;;  %1970 = vmatprep.mubr.msk.bf16.mxu0 %vm2477_vm0, %v2476_v0 }
 0x55c   : > { %1980 = vmatprep.subr.bf16.mxu0 %v2476_v0 }
 0x562   : > { %1971 = vmatmul.mubr.msk.bf16.vlgmr.msra.gmra.mxu0 %vm800_vm2, %v1119_v11 }
 0x563   : > { %1982 = vmatprep.mubr.msk.bf16.mxu0 %vm2477_vm0, %v2476_v0  ;;  %1981 = vmatpush3.bf16.msra.mxu0 %v1234_v47 }
 0x564   : > { %1992 = vmatprep.subr.bf16.mxu0 %v2476_v0 }
 0x61a   : > { %v1063_v14 = vpop.f32.mrf.mxu0 }
 0x61b   : > { %v1069_v15 = vpack.c.bf16 %v1063_v14, %v1063_v14 }
 0x61c   : > { %v1960_v17 = vpop.f32.mrf.mxu0 }
 0x61d   : > { %1965 = vmatmul.mubr.msk.bf16.vlgmr.msra.gmra.mxu1 %vm800_vm2, %v1069_v15 }
 0x61e   : > { %v1066_v18 = vpop.f32.mrf.mxu0  ;;  %1976 = vmatprep.mubr.msk.bf16.mxu1 %vm2477_vm0, %v2476_v0 }
 0x620   : > { %v1961_v19 = vpop.f32.mrf.mxu0 }
 0x622   : > { %v1162_v20 = vpop.f32.mrf.mxu0 }
 0x623   : > { %v1168_v21 = vsel %vm800_vm2, %v1162_v20, -inf }
 0x624   : > { %1169 = vmax.xlane.f32.xlu1 %v1168_v21  ;;  %v1972_v22 = vpop.f32.mrf.mxu0 }
 0x626   : > { %v1165_v23 = vpop.f32.mrf.mxu0 }
 0x628   : > { %v1973_v25 = vpop.f32.mrf.mxu0 }
 0x635   : > { %1180 = vrot.lane.b32.xlu1 %v2749_v16, %s2482_s27  ;;  %s1665_s27 = sshll.u32 %s639_s21, 4  ;;  %s1666_s27 = int_to_ptr.vmem [resolvable:$true] %s1665_s27 }
 0x636   : > { %s2373_s15 = scalar_lea.vmem %s1666_s27, 128  ;;  %p2380_p4 = scmp.lt.s32.totalorder %s1666_s27, %s2378_s19 }
 0x637   : > { %p2374_p0 = scmp.ne.s32.totalorder %s1666_s27, %s2373_s15  ;;  %p2381_p11 = scmp.lt.s32.totalorder %s2379_s24, %s2373_s15 }
 0x639   : > { %1277 = vrot.lane.b32.xlu1 %v2755_v24, %s2483_s25  ;;  %p2375_p8 = pnand %p2374_p0, %p2965_p6  ;;  %p2382_p9 = por %p2381_p11, %p2380_p4 }
 0x63b   : > { %p2376_p7 = pneg %p2375_p8 }
 0x63d   : > { %p2383_p12 = pnand %p2382_p9, %p2376_p7 }
 0x6ad   : > { %v1170_v26 = vpop.xlane.xlu1 %1169 }
 0x6ae   : > { %v1171_v27 = vsub.f32 %v1162_v20, %v1170_v26 }
 0x6b0   : > { %v1172_v28 = vmul.f32 1.442695, %v1171_v27 }
 0x6b1   : > { %v1181_v29 = vpop.permute.xlu1 %1180 }
 0x6b2   : > { %2179 = vpow2.f32 %v1172_v28  ;;  %v1186_v30 = vsel %vm865_vm3, %v1181_v29, 0 }
 0x6b3   : > { %1975 = vmatpush3.bf16.msra.mxu1 %v1186_v30 }
 0x6b4   : > { %1986 = vmatprep.subr.bf16.mxu1 %v2476_v0 }
 0x6b5   : > { %v1278_v45 = vpop.permute.xlu1 %1277 }
 0x6bf   : > { %v2180_v31 = vpop.eup %2179 }
 0x6c0   : > { %v1174_v32 = vsel %vm800_vm2, %v2180_v31, 0.0 }
 0x6c1   : > { %1175 = vadd.xlane.f32.xlu0 %v1174_v32  ;;  %v2165_v32 = vld [vmem:[%s2923_s10 + $0x8] sm:$0xff]  }
 0x6d7   : > { %1279 = vrot.lane.b32.xlu0 %v2749_v16, %s2483_s25 }
 0x6dd   : > { %v1111_v35 = vpop.f32.mrf.mxu1 }
 0x6de   : > { %v1117_v24 = vadd.f32 %v1111_v35, %v957_v34  ;;  %v2168_v34 = vld [vmem:[%s2925_s12 + $0x10] sm:$0xff]  }
 0x6df   : > { %v1966_v36 = vpop.f32.mrf.mxu1 }
 0x6e1   : > { %v1114_v37 = vpop.f32.mrf.mxu1 }
 0x6e3   : > { %v1967_v38 = vpop.f32.mrf.mxu1 }
 0x6e4   : > { %v1860_v38 = vld [vmem:[#allocation11] ss:$0 sm:$0xff] }
 0x74a   : > { %v1176_v39 = vpop.xlane.xlu0 %1175 }
 0x74b   : > { %2181 = vrcp.f32 %v1176_v39 }
 0x74e   : > { %v1280_v42 = vpop.permute.xlu0 %1279 }
 0x74f   : > { %v1285_v44 = vsel %vm800_vm2, %v1280_v42, 0 }
 0x758   : > { %v2182_v40 = vpop.eup %2181 }
 0x759   : > { %v1178_v41 = vmul.f32 %v2182_v40, %v2180_v31  ;;  %v1861_v40 = vld [vmem:[#allocation13] ss:$0 sm:$0xff] }
 0x75b   : > { %v1179_v43 = vpack.c.bf16 %v1178_v41, %v1178_v41 }
 0x75d   : > { %1977 = vmatmul.mubr.msk.bf16.vlgmr.msra.gmra.mxu1 %vm800_vm2, %v1179_v43 }
 0x75e   : > { %1987 = vmatpush3.bf16.xpose.msra.mxu1 %v1285_v44  ;;  %1988 = vmatprep.mubr.msk.bf16.mxu1 %vm2477_vm0, %v2476_v0  ;;  %v2169_v44 = vld [vmem:[%s2925_s12 + $0x8] sm:$0xff]  }
 0x75f   : > { %1998 = vmatprep.subr.bf16.mxu1 %v2476_v0 }
 0x765   : > { %1989 = vmatmul.mubr.msk.bf16.vlgmr.msra.gmra.mxu1 %vm800_vm2, %v1278_v45  ;;  %v2170_v45 = vld [vmem:[%s2925_s12] sm:$0xff]  }
 0x766   : > { %2000 = vmatprep.mubr.msk.bf16.mxu1 %vm2477_vm0, %v2476_v0  ;;  %1999 = vmatpush3.bf16.msra.mxu1 %v1393_v5 }
 0x767   : > { %2012 = vmatprep.subr.bf16.mxu1 %v2476_v0 }
 0x81d   : > { %v1222_v48 = vpop.f32.mrf.mxu1 }
 0x81e   : > { %v1228_v49 = vpack.c.bf16 %v1222_v48, %v1222_v48 }
 0x81f   : > { %v1978_v50 = vpop.f32.mrf.mxu1 }
 0x820   : > { %1983 = vmatmul.mubr.msk.bf16.vlgmr.msra.gmra.mxu0 %vm800_vm2, %v1228_v49 }
 0x821   : > { %v1225_v51 = vpop.f32.mrf.mxu1  ;;  %1994 = vmatprep.mubr.msk.bf16.mxu0 %vm2477_vm0, %v2476_v0 }
 0x823   : > { %v1979_v52 = vpop.f32.mrf.mxu1 }
 0x825   : > { %v1321_v53 = vpop.f32.mrf.mxu1 }
 0x826   : > { %v1327_v54 = vsel %vm800_vm2, %v1321_v53, -inf }
 0x827   : > { %1328 = vmax.xlane.f32.xlu1 %v1327_v54  ;;  %v1990_v55 = vpop.f32.mrf.mxu1 }
 0x829   : > { %v1324_v56 = vpop.f32.mrf.mxu1 }
 0x82b   : > { %v1991_v57 = vpop.f32.mrf.mxu1 }
 0x838   : > { %1339 = vrot.lane.b32.xlu1 %v2749_v16, %s2484_s23 }
 0x8b0   : > { %v1329_v58 = vpop.xlane.xlu1 %1328 }
 0x8b1   : > { %v1330_v59 = vsub.f32 %v1321_v53, %v1329_v58 }
 0x8b3   : > { %v1331_v60 = vmul.f32 1.442695, %v1330_v59 }
 0x8b4   : > { %v1340_v61 = vpop.permute.xlu1 %1339 }
 0x8b5   : > { %2183 = vpow2.f32 %v1331_v60  ;;  %v1345_v62 = vsel %vm865_vm3, %v1340_v61, 0 }
 0x8b6   : > { %1993 = vmatpush3.bf16.msra.mxu0 %v1345_v62 }
 0x8b7   : > { %2004 = vmatprep.subr.bf16.mxu0 %v2476_v0 }
 0x8c2   : > { %v2184_v63 = vpop.eup %2183 }
 0x8c3   : > { %v1333_v1 = vsel %vm800_vm2, %v2184_v63, 0.0 }
 0x8c4   : > { %1334 = vadd.xlane.f32.xlu0 %v1333_v1 }
 0x8e0   : > { %v1270_v2 = vpop.f32.mrf.mxu0 }
 0x8e1   : > { %v1276_v4 = vadd.f32 %v1270_v2, %v1117_v24 }
 0x8e2   : > { %v1984_v16 = vpop.f32.mrf.mxu0 }
 0x8e4   : > { %v1273_v7 = vpop.f32.mrf.mxu0 }
 0x8e5   : > { %v1872_v7 = vld [vmem:[%s2927_s14] ss:$0 sm:$0xff] }
 0x8e6   : > { %v1985_v8 = vpop.f32.mrf.mxu0 }
 0x94d   : > { %v1335_v9 = vpop.xlane.xlu0 %1334 }
 0x94e   : > { %2185 = vrcp.f32 %v1335_v9  ;;  %v1873_v9 = vld [vmem:[%s2963_s29] ss:$0 sm:$0xff] }
 0x95b   : > { %v2186_v10 = vpop.eup %2185 }
 0x95c   : > { %v1337_v11 = vmul.f32 %v2186_v10, %v2184_v63 }
 0x95e   : > { %v1338_v12 = vpack.c.bf16 %v1337_v11, %v1337_v11 }
 0x960   : > { %1995 = vmatmul.mubr.msk.bf16.vlgmr.msra.gmra.mxu0 %vm800_vm2, %v1338_v12 }
 0x961   : > { %2008 = vmatprep.mubr.msk.bf16.mxu0 %vm2477_vm0, %v2476_v0  ;;  %2005 = vmatpush3.bf16.msra.mxu0 %v2165_v32 }
 0x962   : > { %2006 = vmatprep.subr.bf16.mxu0 %v2476_v0 }
 0xa20   : > { %v1381_v13 = vpop.f32.mrf.mxu0 }
 0xa21   : > { %v1387_v14 = vpack.c.bf16 %v1381_v13, %v1381_v13 }
 0xa22   : > { %v1996_v15 = vpop.f32.mrf.mxu0 }
 0xa23   : > { %2001 = vmatmul.mubr.msk.bf16.vlgmr.msra.gmra.mxu1 %vm800_vm2, %v1387_v14 }
 0xa24   : > { %v1384_v17 = vpop.f32.mrf.mxu0  ;;  %2020 = vmatprep.mubr.msk.bf16.mxu1 %vm2477_vm0, %v2476_v0  ;;  %2013 = vmatpush3.bf16.msra.mxu1 %v2167_v33 }
 0xa25   : > { %2014 = vmatprep.subr.bf16.mxu1 %v2476_v0 }
 0xa26   : > { %v1997_v18 = vpop.f32.mrf.mxu0 }
 0xa28   : > { %2015 = vmatpush3.bf16.msra.mxu1 %v2168_v34 }
 0xa29   : > { %2016 = vmatprep.subr.bf16.mxu1 %v2476_v0 }
 0xa2c   : > { %2017 = vmatpush3.bf16.msra.mxu1 %v2169_v44 }
 0xa2d   : > { %2018 = vmatprep.subr.bf16.mxu1 %v2476_v0  ;;  %v1866_v0 = vld [vmem:[%s2926_s13] ss:$0 sm:$0xff] }
 0xa30   : > { %2019 = vmatpush3.bf16.msra.mxu1 %v2170_v45 }
 0xae3   : > { %v1429_v19 = vpop.f32.mrf.mxu1 }
 0xae4   : > { %v1435_v20 = vadd.f32 %v1429_v19, %v1276_v4 }
 0xae5   : > { %v2002_v21 = vpop.f32.mrf.mxu1 }
 0xae6   : > { %v1436_v22 = vadd.f32 %v1435_v20, %v2737_v6  ;;  %v2166_v6 = vld [vmem:[%s2923_s10] sm:$0xff]  }
 0xae7   : > { %v1432_v23 = vpop.f32.mrf.mxu1  ;;  %2007 = vmatpush3.bf16.msra.mxu0 %v2166_v6 }
 0xae8   : > { %v1439_v25 = vsel %vm679_vm1, %v1436_v22, 0.0 }
 0xae9   : > { %1440 = vadd.xlane.f32.xlu0 %v1439_v25  ;;  %v2003_v26 = vpop.f32.mrf.mxu1 }
 0xb72   : > { %v1441_v27 = vpop.xlane.xlu0 %1440 }
 0xb73   : > { %v1443_v28 = vmul.f32 0.03125, %v1441_v27 }
 0xb75   : > { %v1444_v29 = vsub.f32 %v1436_v22, %v1443_v28 }
 0xb77   : > { %v1445_v30 = vmul.f32 %v1444_v29, %v1444_v29 }
 0xb79   : > { %v1446_v31 = vsel %vm679_vm1, %v1445_v30, 0.0 }
 0xb7a   : > { %1447 = vadd.xlane.f32.xlu0 %v1446_v31 }
 0xc03   : > { %v1448_v35 = vpop.xlane.xlu0 %1447 }
 0xc04   : > { %v1449_v24 = vmul.f32 0.03125, %v1448_v35 }
 0xc06   : > { %v1450_v36 = vadd.f32 1e-05, %v1449_v24 }
 0xc08   : > { %2187 = vrsqrt.f32 %v1450_v36 }
 0xc15   : > { %v2188_v37 = vpop.eup %2187 }
 0xc16   : > { %v1452_v39 = vmul.f32 %v2188_v37, %v1444_v29 }
 0xc18   : > { %v1459_v41 = vmul.f32 %v1860_v38, %v1452_v39 }
 0xc1a   : > { %v1466_v42 = vadd.f32 %v1861_v40, %v1459_v41 }
 0xc1c   : > { %v1467_v43 = vpack.c.bf16 %v1466_v42, %v1466_v42 }
 0xc1e   : > { %2009 = vmatmul.mubr.msk.bf16.vlgmr.msra.gmra.mxu0 %vm679_vm1, %v1467_v43 }
 0xcde   : > { %v1528_v47 = vpop.f32.mrf.mxu0 }
 0xcdf   : > { %v1529_v48 = vadd.f32 %v1862_v46, %v1528_v47 }
 0xce0   : > { %v2010_v49 = vpop.f32.mrf.mxu0 }
 0xce1   : > { %v1534_v50 = vmax.f32 %v1529_v48, 0.0 }
 0xce2   : > { %v1531_v51 = vpop.f32.mrf.mxu0 }
 0xce3   : > { %v1535_v52 = vpack.c.bf16 %v1534_v50, %v1534_v50 }
 0xce4   : > { %v2011_v53 = vpop.f32.mrf.mxu0 }
 0xce5   : > { %2021 = vmatmul.mubr.msk.bf16.vlgmr.msra.gmra.mxu1 %vm1575_vm4, %v1535_v52 }
 0xda5   : > { %v1613_v54 = vpop.f32.mrf.mxu1 }
 0xda6   : > { %v1614_v55 = vadd.f32 %v1866_v0, %v1613_v54 }
 0xda7   : > { %v2022_v56 = vpop.f32.mrf.mxu1 }
 0xda8   : > { %v1619_v57 = vadd.f32 %v1614_v55, %v1466_v42 }
 0xda9   : > { %v1616_v58 = vpop.f32.mrf.mxu1 }
 0xdaa   : > { %v1622_v59 = vsel %vm679_vm1, %v1619_v57, 0.0 }
 0xdab   : > { %1623 = vadd.xlane.f32.xlu0 %v1622_v59  ;;  %v2023_v60 = vpop.f32.mrf.mxu1 }
 0xe34   : > { %v1624_v61 = vpop.xlane.xlu0 %1623 }
 0xe35   : > { %v1625_v62 = vmul.f32 0.03125, %v1624_v61 }
 0xe37   : > { %v1626_v63 = vsub.f32 %v1619_v57, %v1625_v62 }
 0xe39   : > { %v1627_v1 = vmul.f32 %v1626_v63, %v1626_v63 }
 0xe3b   : > { %v1628_v2 = vsel %vm679_vm1, %v1627_v1, 0.0 }
 0xe3c   : > { %1629 = vadd.xlane.f32.xlu1 %v1628_v2 }
 0xec5   : > { %v1630_v3 = vpop.xlane.xlu1 %1629 }
 0xec6   : > { %v1631_v4 = vmul.f32 0.03125, %v1630_v3 }
 0xec8   : > { %v1632_v5 = vadd.f32 1e-05, %v1631_v4 }
 0xeca   : > { %2189 = vrsqrt.f32 %v1632_v5 }
 0xed7   : > { %v2190_v16 = vpop.eup %2189 }
 0xed8   : > { %v1634_v8 = vmul.f32 %v2190_v16, %v1626_v63 }
 0xeda   : > { %v1641_v10 = vmul.f32 %v1872_v7, %v1634_v8 }
 0xedc   : > { %v1648_v11 = vadd.f32 %v1873_v9, %v1641_v10 }
 0xede   : > { %1649 = vst.msk [vmem:[%s639_s21] sm:$0xff] %vm679_vm1, %v1648_v11 }
 0xedf   : > { %2386 = shalt.err (!%p2383_p12)
}
 0xee0   : > { %s2387_s16 = scalar_lea.hbm %s1663_s26, 128  ;;  %s2391_s29 = scalar_lea.hbm %s2964_s17, 256 }
 0xee1   : > { %p2388_p1 = scmp.ne.s32.totalorder %s1663_s26, %s2387_s16  ;;  %p2392_p3 = scmp.lt.s32.totalorder %s1663_s26, %s2964_s17 }
 0xee2   : > { %p2393_p10 = scmp.lt.s32.totalorder %s2391_s29, %s2387_s16 }
 0xee3   : > { %p2389_p2 = pnand %p2388_p1, %p2965_p6 }
 0xee4   : > { %p2394_p13 = por %p2393_p10, %p2392_p3 }
 0xee5   : > { %p2390_p5 = pneg %p2389_p2 }
 0xee7   : > { %p2395_p0 = pnand %p2394_p13, %p2390_p5 }
 0xee9   : > { %2398 = shalt.err (!%p2395_p0)
}
 0xeea   : > { %2052 = dma.vmem_to_hbm [thread:$0]  (%p2965_p6), %s1666_s27, 128, %s1663_s26, %s1651_s1  }
 0xeeb PF: > { %s2966_s25 = sld [smem:[#allocation23_spill]] }
 0xeec   : > { %s2967_s23 = sld [smem:[#allocation20_spill]] }
 0xeed   : > { %s2968_s15 = sld [smem:[#allocation25_spill]] }
 0xef1   : > { %p2094_p8 = scmp.ge.s32.totalorder %s2966_s25, 2 }
 0xef2   : > { %s1677_s28 = sand.u32 1, %s2967_s23  }
 0xef3   : > { %p2969_p7 = scmp.ne.s32.totalorder %s2968_s15, 0  ;;  %s1678_s19 = scalar_lea.sflag [#allocation4], %s1677_s28 }
 0xef5   : > { %p2077_p4 = pnand %p2094_p8, %p2969_p7 }
 0xef7   : > { %p2078_p11 = pneg %p2077_p4 }
 0xef9   : > { %2440 = dma.done.wait (%p2078_p11), %s1678_s19, 128  }
 0xefa   : > { %2442 = vsyncadd (%p2078_p11), %s1678_s19, 4294967168  ;;  %s33_s26 = sadd.s32 1, %s2966_s25   ;;  %s2970_s24 = sld [smem:[#allocation21_spill]] }
 0xefb   : > { %p30_p9 = scmp.ge.s32.totalorder %s33_s26, 4   ;;  %s2971_s23 = sld [smem:[#allocation26_spill]] }
 0xefc   : > { %s2972_s0 = sld [smem:[#allocation22_spill]]  ;;  %s2974_s21 = smov %s2449_s22 }
 0xefd   : > { %s2973_s25 = sld [smem:[#allocation24_spill]] }
 0xefe   :  { %32 = sbr.rel (!%p30_p9) target bundleno = 13 (0xd), region = 151 }
 0xf00   : > { %s2975_s22 = smov %s2970_s24 }
 0xf02   : > { %s2976_s24 = smov %s2972_s0 }
 0xf03   :  { %1683 = vsyncpa [#allocation3], 1 }
 0xf04   :  { %1685 = vsyncpa [#allocation3 + $0x1], 1 }
 0xf05   :  { %1686 = vsyncpa [#allocation6], 1 }
 0xf06   :  { %1687 = vsyncpa [#allocation9], 1 }
 0xf07   :  { %1688 = vsyncpa [#allocation12], 1 }
 0xf08   :  { %1689 = vsyncpa [#allocation4], 1 }
 0xf09   :  { %1691 = vsyncpa [#allocation4 + $0x1], 1 }

</bundles_post_ra>
